<compile_context>
chip_gen: v6e
topology: v6e:2x2x1
jax: 0.10.0
libtpu: 0.0.40
codegen_flags: <defaults>
</compile_context>

<pallas_src>
import math

import jax
import jax.numpy as jnp
import numpy as np
from jax.experimental import pallas as pl
from jax.experimental.pallas import tpu as pltpu

# ----------------------------- model hyper-params -----------------------------
B = 2            # batch
N = 16           # tokens (4 x 4 patch grid)
D = 32           # embedding dim
NH = 4           # attention heads
HD = D // NH     # head dim = 8
MLP = 64         # MLP hidden dim
PATCH = 4        # patch size
C_OUT = 3        # output image channels
P_OUT = PATCH * PATCH * C_OUT   # per-token pixels = 48
OUT_PAD = 128                   # lane-dense padded head width
GRID_HW = int(math.isqrt(N))    # 4
IMG = GRID_HW * PATCH           # 16
BN = B * N                      # 32
LN_EPS = 1e-5                   # PyTorch nn.LayerNorm default

# ------------------------- packed parameter slab layout -----------------------
# Vector slab (V_ROWS, 128): one row per LN gamma/beta or bias, values left-aligned.
V_ROWS = 16
_R_LN1G, _R_LN1B = 0, 1
_R_LN2G, _R_LN2B = 2, 3
_R_LNFG, _R_LNFB = 4, 5
_R_BQKV = 6          # lanes 0:96  (scale folded into q lanes 0:32)
_R_BO = 7            # lanes 0:32
_R_B1 = 8            # lanes 0:64
_R_B2 = 9            # lanes 0:32
_R_BH = 10           # lanes 0:128 (padded)

# Matrix slab (W_ROWS, 128): small weight matrices stacked along sublanes.
_W_QKV_ROW = 0       # rows   0: 32, lanes  0: 96  -> wqkv (scale folded into q cols)
_W_WO_LANE = 3 * D   # rows   0: 32, lanes 96:128  -> wo
_W_W1_ROW = 32       # rows  32: 64, lanes  0: 64  -> w1
_W_W2_ROW = 64       # rows  64:128, lanes  0: 32  -> w2
_W_WH_ROW = 128      # rows 128:160, lanes  0:128  -> wh (lane-padded)
_W_POS_ROW = 160     # rows 160:176, lanes  0: 32  -> pos embedding
W_ROWS = 176


def _layer_norm(x, g, b, eps=LN_EPS):
    mu = jnp.mean(x, axis=-1, keepdims=True)
    var = jnp.mean((x - mu) ** 2, axis=-1, keepdims=True)
    return (x - mu) * jax.lax.rsqrt(var + eps) * g + b


# --------------------------------- kernel ------------------------------------
def vit_decoder_kernel(x_ref, vec_ref, w_ref, out_ref):
    """One grid step = one batch element: (N, D) tokens -> (N, OUT_PAD) patch pixels."""
    f32 = jnp.float32

    x = x_ref[...] + w_ref[_W_POS_ROW:_W_POS_ROW + N, :D]              # (N, D)

    # ---- pre-LN multi-head self-attention ----
    xn = _layer_norm(x, vec_ref[_R_LN1G:_R_LN1G + 1, :D],
                     vec_ref[_R_LN1B:_R_LN1B + 1, :D])

    # Fused QKV projection: one (N,D)@(D,3D) matmul; 1/sqrt(HD) already folded
    # into the q columns of wqkv and the q lanes of bqkv.
    qkv = (jnp.dot(xn, w_ref[0:D, 0:3 * D], preferred_element_type=f32)
           + vec_ref[_R_BQKV:_R_BQKV + 1, :3 * D])                     # (N, 3D)

    dn = (((1,), (1,)), ((), ()))                                      # q @ k^T
    pv_heads = []
    for h in range(NH):
        qh = qkv[:, h * HD:(h + 1) * HD]
        kh = qkv[:, D + h * HD:D + (h + 1) * HD]
        vh = qkv[:, 2 * D + h * HD:2 * D + (h + 1) * HD]
        s = jax.lax.dot_general(qh, kh, dn, preferred_element_type=f32)  # (N, N)
        s = s - jnp.max(s, axis=-1, keepdims=True)
        e = jnp.exp(s)
        p = e / jnp.sum(e, axis=-1, keepdims=True)                       # exact recip
        pv_heads.append(jnp.dot(p, vh, preferred_element_type=f32))      # (N, HD)

    # Lane-axis head concat + single output projection against the full (D, D) wo.
    attn = jnp.concatenate(pv_heads, axis=-1)                            # (N, D)
    x = (x
         + jnp.dot(attn, w_ref[0:D, _W_WO_LANE:_W_WO_LANE + D],
                   preferred_element_type=f32)
         + vec_ref[_R_BO:_R_BO + 1, :D])

    # ---- pre-LN MLP ----
    xn2 = _layer_norm(x, vec_ref[_R_LN2G:_R_LN2G + 1, :D],
                      vec_ref[_R_LN2B:_R_LN2B + 1, :D])
    h1 = (jnp.dot(xn2, w_ref[_W_W1_ROW:_W_W1_ROW + D, :MLP],
                  preferred_element_type=f32)
          + vec_ref[_R_B1:_R_B1 + 1, :MLP])
    # TODO(synk): PyTorch nn.GELU default is exact erf-GELU; tanh approximation is
    # used here (and, consistently, in the reference below).
    h1 = jax.nn.gelu(h1, approximate=True)
    x = (x
         + jnp.dot(h1, w_ref[_W_W2_ROW:_W_W2_ROW + MLP, :D],
                   preferred_element_type=f32)
         + vec_ref[_R_B2:_R_B2 + 1, :D])

    # ---- final LN + lane-padded patch-pixel head (unmasked 128-lane store) ----
    xf = _layer_norm(x, vec_ref[_R_LNFG:_R_LNFG + 1, :D],
                     vec_ref[_R_LNFB:_R_LNFB + 1, :D])
    out_ref[...] = (jnp.dot(xf, w_ref[_W_WH_ROW:_W_WH_ROW + D, :],
                            preferred_element_type=f32)
                    + vec_ref[_R_BH:_R_BH + 1, :])


# -------------------------------- wrapper -------------------------------------
@jax.jit
def vit_decoder_forward(x, kparams):
    """x: (B, N, D) float32 tokens -> image (B, C_OUT, IMG, IMG) float32 (NCHW)."""
    x2 = x.reshape(BN, D)

    tokens_pad = pl.pallas_call(
        vit_decoder_kernel,
        out_shape=jax.ShapeDtypeStruct((BN, OUT_PAD), jnp.float32),
        grid=(B,),
        in_specs=[
            pl.BlockSpec((N, D), lambda b: (b, 0)),            # per-batch token block
            pl.BlockSpec((V_ROWS, 128), lambda b: (0, 0)),     # vector slab (resident)
            pl.BlockSpec((W_ROWS, 128), lambda b: (0, 0)),     # matrix slab (resident)
        ],
        out_specs=pl.BlockSpec((N, OUT_PAD), lambda b: (b, 0)),
        compiler_params=pltpu.CompilerParams(dimension_semantics=("parallel",)),
    )(x2, kparams["vec"], kparams["wslab"])

    # slice away the lane padding, then un-patchify: (B, N, P) -> (B, C, H, W)
    tokens = tokens_pad[:, :P_OUT].reshape(B, N, P_OUT)
    img = tokens.reshape(B, GRID_HW, GRID_HW, PATCH, PATCH, C_OUT)
    img = img.transpose(0, 5, 1, 3, 2, 4)                      # (B, C, gh, patch, gw, patch)
    img = img.reshape(B, C_OUT, IMG, IMG)
    return img


# -------------------------- deterministic parameter init ----------------------
def init_params(key):
    ks = jax.random.split(key, 8)
    s = 0.02
    return {
        "pos":   s * jax.random.normal(ks[0], (N, D), jnp.float32),
        "ln1_g": jnp.ones((1, D), jnp.float32),
        "ln1_b": jnp.zeros((1, D), jnp.float32),
        "wqkv":  s * jax.random.normal(ks[1], (D, 3 * D), jnp.float32),
        "bqkv":  jnp.zeros((1, 3 * D), jnp.float32),
        "wo":    s * jax.random.normal(ks[2], (D, D), jnp.float32),
        "bo":    jnp.zeros((1, D), jnp.float32),
        "ln2_g": jnp.ones((1, D), jnp.float32),
        "ln2_b": jnp.zeros((1, D), jnp.float32),
        "w1":    s * jax.random.normal(ks[3], (D, MLP), jnp.float32),
        "b1":    jnp.zeros((1, MLP), jnp.float32),
        "w2":    s * jax.random.normal(ks[4], (MLP, D), jnp.float32),
        "b2":    jnp.zeros((1, D), jnp.float32),
        "lnf_g": jnp.ones((1, D), jnp.float32),
        "lnf_b": jnp.zeros((1, D), jnp.float32),
        "wh":    s * jax.random.normal(ks[5], (D, P_OUT), jnp.float32),
        "bh":    jnp.zeros((1, P_OUT), jnp.float32),
    }


def prepare_kernel_params(p):
    """One-time re-layout of canonical params into the two packed kernel slabs."""
    f32 = jnp.float32
    scale = 1.0 / math.sqrt(HD)

    # ---- vector slab ----
    vec = jnp.zeros((V_ROWS, 128), f32)
    vec = vec.at[_R_LN1G, :D].set(p["ln1_g"][0])
    vec = vec.at[_R_LN1B, :D].set(p["ln1_b"][0])
    vec = vec.at[_R_LN2G, :D].set(p["ln2_g"][0])
    vec = vec.at[_R_LN2B, :D].set(p["ln2_b"][0])
    vec = vec.at[_R_LNFG, :D].set(p["lnf_g"][0])
    vec = vec.at[_R_LNFB, :D].set(p["lnf_b"][0])
    vec = vec.at[_R_BQKV, :D].set(p["bqkv"][0, :D] * scale)      # fold scale into q bias
    vec = vec.at[_R_BQKV, D:3 * D].set(p["bqkv"][0, D:])
    vec = vec.at[_R_BO, :D].set(p["bo"][0])
    vec = vec.at[_R_B1, :MLP].set(p["b1"][0])
    vec = vec.at[_R_B2, :D].set(p["b2"][0])
    vec = vec.at[_R_BH, :P_OUT].set(p["bh"][0])

    # ---- matrix slab ----
    wqkv_scaled = jnp.concatenate([p["wqkv"][:, :D] * scale, p["wqkv"][:, D:]], axis=1)
    w = jnp.zeros((W_ROWS, 128), f32)
    w = w.at[0:D, 0:3 * D].set(wqkv_scaled)
    w = w.at[0:D, _W_WO_LANE:_W_WO_LANE + D].set(p["wo"])
    w = w.at[_W_W1_ROW:_W_W1_ROW + D, 0:MLP].set(p["w1"])
    w = w.at[_W_W2_ROW:_W_W2_ROW + MLP, 0:D].set(p["w2"])
    w = w.at[_W_WH_ROW:_W_WH_ROW + D, 0:P_OUT].set(p["wh"])
    w = w.at[_W_POS_ROW:_W_POS_ROW + N, 0:D].set(p["pos"])

    return {"vec": vec, "wslab": w}


# ------------------------------ pure-JAX reference -----------------------------
def reference_forward(x, p):
    def one(xb):
        h = xb + p["pos"]
        xn = _layer_norm(h, p["ln1_g"], p["ln1_b"])
        qkv = xn @ p["wqkv"] + p["bqkv"]
        q, k, v = qkv[:, :D], qkv[:, D:2 * D], qkv[:, 2 * D:]
        outs = []
        for hh in range(NH):
            qh = q[:, hh * HD:(hh + 1) * HD]
            kh = k[:, hh * HD:(hh + 1) * HD]
            vh = v[:, hh * HD:(hh + 1) * HD]
            s = (qh @ kh.T) / math.sqrt(HD)
            pmat = jax.nn.softmax(s, axis=-1)
            outs.append(pmat @ vh)
        attn = jnp.concatenate(outs, axis=-1) @ p["wo"] + p["bo"]
        h = h + attn
        xn2 = _layer_norm(h, p["ln2_g"], p["ln2_b"])
        mlp = jax.nn.gelu(xn2 @ p["w1"] + p["b1"], approximate=True) @ p["w2"] + p["b2"]
        h = h + mlp
        xf = _layer_norm(h, p["lnf_g"], p["lnf_b"])
        return xf @ p["wh"] + p["bh"]

    tokens = jax.vmap(one)(x)
    img = tokens.reshape(B, GRID_HW, GRID_HW, PATCH, PATCH, C_OUT)
    img = img.transpose(0, 5, 1, 3, 2, 4).reshape(B, C_OUT, IMG, IMG)
    return img


# ----------------------------------- main --------------------------------------
if __name__ == "__main__":
    # Full-precision f32 matmuls in the XLA reference so it matches the kernel's
    # f32 MXU accumulation.
    jax.config.update("jax_default_matmul_precision", "highest")

    key = jax.random.PRNGKey(0)
    kx, kp = jax.random.split(key)
    x = jax.random.normal(kx, (B, N, D), jnp.float32)        # decoder token input
    params = init_params(kp)
    kparams = prepare_kernel_params(params)                   # one-time weight re-layout

    out = vit_decoder_forward(x, kparams)
    out = jax.block_until_ready(out)

    ref = jax.block_until_ready(reference_forward(x, params))
    assert out.shape == (B, C_OUT, IMG, IMG)
    np.testing.assert_allclose(np.asarray(out), np.asarray(ref), rtol=1e-4, atol=2e-5)

    print("KERNEL_OK")
</pallas_src>

<mosaic_0001>
module attributes {stable_mosaic.version = 11 : i64} {
  func.func @vit_decoder_kernel(%arg0: i32, %arg1: memref<16x32xf32, #tpu.memory_space<vmem>>, %arg2: memref<16x128xf32, #tpu.memory_space<vmem>>, %arg3: memref<176x128xf32, #tpu.memory_space<vmem>>, %arg4: memref<16x128xf32, #tpu.memory_space<vmem>>) attributes {dimension_semantics = [#tpu.dimension_semantics<parallel>], iteration_bounds = array<i64: 2>, scalar_prefetch = 0 : i64, scratch_operands = 0 : i64, tpu.core_type = #tpu.core_type<tc>, window_params = [{transform_indices = @transform_0, window_bounds = array<i64: 16, 32>}, {pipeline_mode = #tpu.pipeline_mode<synchronous>, transform_indices = @transform_1, window_bounds = array<i64: 16, 128>}, {pipeline_mode = #tpu.pipeline_mode<synchronous>, transform_indices = @transform_2, window_bounds = array<i64: 176, 128>}, {transform_indices = @transform_3, window_bounds = array<i64: 16, 128>}]} {
    %c0 = arith.constant 0 : index
    %c0_0 = arith.constant 0 : index
    %0 = vector.load %arg1[%c0, %c0_0] : memref<16x32xf32, #tpu.memory_space<vmem>>, vector<16x32xf32>
    %c160 = arith.constant 160 : index
    %c0_1 = arith.constant 0 : index
    %1 = vector.load %arg3[%c160, %c0_1] : memref<176x128xf32, #tpu.memory_space<vmem>>, vector<16x32xf32>
    %2 = arith.addf %0, %1 : vector<16x32xf32>
    %c0_2 = arith.constant 0 : index
    %c0_3 = arith.constant 0 : index
    %3 = vector.load %arg2[%c0_2, %c0_3] : memref<16x128xf32, #tpu.memory_space<vmem>>, vector<1x32xf32>
    %c1 = arith.constant 1 : index
    %c0_4 = arith.constant 0 : index
    %4 = vector.load %arg2[%c1, %c0_4] : memref<16x128xf32, #tpu.memory_space<vmem>>, vector<1x32xf32>
    %cst = arith.constant dense<0.000000e+00> : vector<16xf32>
    %5 = vector.multi_reduction <add>, %2, %cst [1] : vector<16x32xf32> to vector<16xf32>
    %6 = vector.shape_cast %5 : vector<16xf32> to vector<16x1xf32>
    %cst_5 = arith.constant 3.200000e+01 : f32
    %7 = vector.broadcast %cst_5 : f32 to vector<16x1xf32>
    %8 = arith.divf %6, %7 : vector<16x1xf32>
    %9 = vector.broadcast %8 : vector<16x1xf32> to vector<16x32xf32>
    %10 = arith.subf %2, %9 : vector<16x32xf32>
    %11 = arith.mulf %10, %10 : vector<16x32xf32>
    %cst_6 = arith.constant dense<0.000000e+00> : vector<16xf32>
    %12 = vector.multi_reduction <add>, %11, %cst_6 [1] : vector<16x32xf32> to vector<16xf32>
    %13 = vector.shape_cast %12 : vector<16xf32> to vector<16x1xf32>
    %cst_7 = arith.constant 3.200000e+01 : f32
    %14 = vector.broadcast %cst_7 : f32 to vector<16x1xf32>
    %15 = arith.divf %13, %14 : vector<16x1xf32>
    %16 = vector.broadcast %8 : vector<16x1xf32> to vector<16x32xf32>
    %17 = arith.subf %2, %16 : vector<16x32xf32>
    %cst_8 = arith.constant 9.99999974E-6 : f32
    %18 = vector.broadcast %cst_8 : f32 to vector<16x1xf32>
    %19 = arith.addf %15, %18 : vector<16x1xf32>
    %20 = math.rsqrt %19 : vector<16x1xf32>
    %21 = vector.broadcast %20 : vector<16x1xf32> to vector<16x32xf32>
    %22 = arith.mulf %17, %21 : vector<16x32xf32>
    %23 = vector.broadcast %3 : vector<1x32xf32> to vector<16x32xf32>
    %24 = arith.mulf %22, %23 : vector<16x32xf32>
    %25 = vector.broadcast %4 : vector<1x32xf32> to vector<16x32xf32>
    %26 = arith.addf %24, %25 : vector<16x32xf32>
    %c0_9 = arith.constant 0 : index
    %c0_10 = arith.constant 0 : index
    %27 = vector.load %arg3[%c0_9, %c0_10] : memref<176x128xf32, #tpu.memory_space<vmem>>, vector<32x96xf32>
    %cst_11 = arith.constant dense<0.000000e+00> : vector<16x96xf32>
    %28 = tpu.matmul %26, %27, %cst_11 {dimension_numbers = #tpu.dot_dimension_numbers<[1], [0], [0], [1], [0, 0, 1, 1], [], []>, precision = #tpu.contract_precision<fp32>} : vector<16x32xf32>, vector<32x96xf32>, vector<16x96xf32> -> vector<16x96xf32>
    %c6 = arith.constant 6 : index
    %c0_12 = arith.constant 0 : index
    %29 = vector.load %arg2[%c6, %c0_12] : memref<16x128xf32, #tpu.memory_space<vmem>>, vector<1x96xf32>
    %30 = vector.broadcast %29 : vector<1x96xf32> to vector<16x96xf32>
    %31 = arith.addf %28, %30 : vector<16x96xf32>
    %32 = vector.extract_strided_slice %31 {offsets = [0, 0], sizes = [16, 8], strides = [1, 1]} : vector<16x96xf32> to vector<16x8xf32>
    %33 = vector.extract_strided_slice %31 {offsets = [0, 32], sizes = [16, 8], strides = [1, 1]} : vector<16x96xf32> to vector<16x8xf32>
    %34 = vector.extract_strided_slice %31 {offsets = [0, 64], sizes = [16, 8], strides = [1, 1]} : vector<16x96xf32> to vector<16x8xf32>
    %cst_13 = arith.constant dense<0.000000e+00> : vector<16x16xf32>
    %35 = tpu.matmul %32, %33, %cst_13 {dimension_numbers = #tpu.dot_dimension_numbers<[1], [1], [0], [0], [0, 0, 1, 0], [], []>, precision = #tpu.contract_precision<fp32>} : vector<16x8xf32>, vector<16x8xf32>, vector<16x16xf32> -> vector<16x16xf32>
    %cst_14 = arith.constant dense<0xFF800000> : vector<16xf32>
    %36 = vector.multi_reduction <maximumf>, %35, %cst_14 [1] : vector<16x16xf32> to vector<16xf32>
    %37 = vector.shape_cast %36 : vector<16xf32> to vector<16x1xf32>
    %38 = vector.broadcast %37 : vector<16x1xf32> to vector<16x16xf32>
    %39 = arith.subf %35, %38 : vector<16x16xf32>
    %40 = math.exp %39 : vector<16x16xf32>
    %cst_15 = arith.constant dense<0.000000e+00> : vector<16xf32>
    %41 = vector.multi_reduction <add>, %40, %cst_15 [1] : vector<16x16xf32> to vector<16xf32>
    %42 = vector.shape_cast %41 : vector<16xf32> to vector<16x1xf32>
    %43 = vector.broadcast %42 : vector<16x1xf32> to vector<16x16xf32>
    %44 = arith.divf %40, %43 : vector<16x16xf32>
    %cst_16 = arith.constant dense<0.000000e+00> : vector<16x8xf32>
    %45 = tpu.matmul %44, %34, %cst_16 {dimension_numbers = #tpu.dot_dimension_numbers<[1], [0], [0], [1], [0, 0, 1, 1], [], []>, precision = #tpu.contract_precision<fp32>} : vector<16x16xf32>, vector<16x8xf32>, vector<16x8xf32> -> vector<16x8xf32>
    %46 = vector.extract_strided_slice %31 {offsets = [0, 8], sizes = [16, 8], strides = [1, 1]} : vector<16x96xf32> to vector<16x8xf32>
    %47 = vector.extract_strided_slice %31 {offsets = [0, 40], sizes = [16, 8], strides = [1, 1]} : vector<16x96xf32> to vector<16x8xf32>
    %48 = vector.extract_strided_slice %31 {offsets = [0, 72], sizes = [16, 8], strides = [1, 1]} : vector<16x96xf32> to vector<16x8xf32>
    %cst_17 = arith.constant dense<0.000000e+00> : vector<16x16xf32>
    %49 = tpu.matmul %46, %47, %cst_17 {dimension_numbers = #tpu.dot_dimension_numbers<[1], [1], [0], [0], [0, 0, 1, 0], [], []>, precision = #tpu.contract_precision<fp32>} : vector<16x8xf32>, vector<16x8xf32>, vector<16x16xf32> -> vector<16x16xf32>
    %cst_18 = arith.constant dense<0xFF800000> : vector<16xf32>
    %50 = vector.multi_reduction <maximumf>, %49, %cst_18 [1] : vector<16x16xf32> to vector<16xf32>
    %51 = vector.shape_cast %50 : vector<16xf32> to vector<16x1xf32>
    %52 = vector.broadcast %51 : vector<16x1xf32> to vector<16x16xf32>
    %53 = arith.subf %49, %52 : vector<16x16xf32>
    %54 = math.exp %53 : vector<16x16xf32>
    %cst_19 = arith.constant dense<0.000000e+00> : vector<16xf32>
    %55 = vector.multi_reduction <add>, %54, %cst_19 [1] : vector<16x16xf32> to vector<16xf32>
    %56 = vector.shape_cast %55 : vector<16xf32> to vector<16x1xf32>
    %57 = vector.broadcast %56 : vector<16x1xf32> to vector<16x16xf32>
    %58 = arith.divf %54, %57 : vector<16x16xf32>
    %cst_20 = arith.constant dense<0.000000e+00> : vector<16x8xf32>
    %59 = tpu.matmul %58, %48, %cst_20 {dimension_numbers = #tpu.dot_dimension_numbers<[1], [0], [0], [1], [0, 0, 1, 1], [], []>, precision = #tpu.contract_precision<fp32>} : vector<16x16xf32>, vector<16x8xf32>, vector<16x8xf32> -> vector<16x8xf32>
    %60 = vector.extract_strided_slice %31 {offsets = [0, 16], sizes = [16, 8], strides = [1, 1]} : vector<16x96xf32> to vector<16x8xf32>
    %61 = vector.extract_strided_slice %31 {offsets = [0, 48], sizes = [16, 8], strides = [1, 1]} : vector<16x96xf32> to vector<16x8xf32>
    %62 = vector.extract_strided_slice %31 {offsets = [0, 80], sizes = [16, 8], strides = [1, 1]} : vector<16x96xf32> to vector<16x8xf32>
    %cst_21 = arith.constant dense<0.000000e+00> : vector<16x16xf32>
    %63 = tpu.matmul %60, %61, %cst_21 {dimension_numbers = #tpu.dot_dimension_numbers<[1], [1], [0], [0], [0, 0, 1, 0], [], []>, precision = #tpu.contract_precision<fp32>} : vector<16x8xf32>, vector<16x8xf32>, vector<16x16xf32> -> vector<16x16xf32>
    %cst_22 = arith.constant dense<0xFF800000> : vector<16xf32>
    %64 = vector.multi_reduction <maximumf>, %63, %cst_22 [1] : vector<16x16xf32> to vector<16xf32>
    %65 = vector.shape_cast %64 : vector<16xf32> to vector<16x1xf32>
    %66 = vector.broadcast %65 : vector<16x1xf32> to vector<16x16xf32>
    %67 = arith.subf %63, %66 : vector<16x16xf32>
    %68 = math.exp %67 : vector<16x16xf32>
    %cst_23 = arith.constant dense<0.000000e+00> : vector<16xf32>
    %69 = vector.multi_reduction <add>, %68, %cst_23 [1] : vector<16x16xf32> to vector<16xf32>
    %70 = vector.shape_cast %69 : vector<16xf32> to vector<16x1xf32>
    %71 = vector.broadcast %70 : vector<16x1xf32> to vector<16x16xf32>
    %72 = arith.divf %68, %71 : vector<16x16xf32>
    %cst_24 = arith.constant dense<0.000000e+00> : vector<16x8xf32>
    %73 = tpu.matmul %72, %62, %cst_24 {dimension_numbers = #tpu.dot_dimension_numbers<[1], [0], [0], [1], [0, 0, 1, 1], [], []>, precision = #tpu.contract_precision<fp32>} : vector<16x16xf32>, vector<16x8xf32>, vector<16x8xf32> -> vector<16x8xf32>
    %74 = vector.extract_strided_slice %31 {offsets = [0, 24], sizes = [16, 8], strides = [1, 1]} : vector<16x96xf32> to vector<16x8xf32>
    %75 = vector.extract_strided_slice %31 {offsets = [0, 56], sizes = [16, 8], strides = [1, 1]} : vector<16x96xf32> to vector<16x8xf32>
    %76 = vector.extract_strided_slice %31 {offsets = [0, 88], sizes = [16, 8], strides = [1, 1]} : vector<16x96xf32> to vector<16x8xf32>
    %cst_25 = arith.constant dense<0.000000e+00> : vector<16x16xf32>
    %77 = tpu.matmul %74, %75, %cst_25 {dimension_numbers = #tpu.dot_dimension_numbers<[1], [1], [0], [0], [0, 0, 1, 0], [], []>, precision = #tpu.contract_precision<fp32>} : vector<16x8xf32>, vector<16x8xf32>, vector<16x16xf32> -> vector<16x16xf32>
    %cst_26 = arith.constant dense<0xFF800000> : vector<16xf32>
    %78 = vector.multi_reduction <maximumf>, %77, %cst_26 [1] : vector<16x16xf32> to vector<16xf32>
    %79 = vector.shape_cast %78 : vector<16xf32> to vector<16x1xf32>
    %80 = vector.broadcast %79 : vector<16x1xf32> to vector<16x16xf32>
    %81 = arith.subf %77, %80 : vector<16x16xf32>
    %82 = math.exp %81 : vector<16x16xf32>
    %cst_27 = arith.constant dense<0.000000e+00> : vector<16xf32>
    %83 = vector.multi_reduction <add>, %82, %cst_27 [1] : vector<16x16xf32> to vector<16xf32>
    %84 = vector.shape_cast %83 : vector<16xf32> to vector<16x1xf32>
    %85 = vector.broadcast %84 : vector<16x1xf32> to vector<16x16xf32>
    %86 = arith.divf %82, %85 : vector<16x16xf32>
    %cst_28 = arith.constant dense<0.000000e+00> : vector<16x8xf32>
    %87 = tpu.matmul %86, %76, %cst_28 {dimension_numbers = #tpu.dot_dimension_numbers<[1], [0], [0], [1], [0, 0, 1, 1], [], []>, precision = #tpu.contract_precision<fp32>} : vector<16x16xf32>, vector<16x8xf32>, vector<16x8xf32> -> vector<16x8xf32>
    %88 = tpu.concatenate %45, %59, %73, %87 in 1 : vector<16x8xf32>, vector<16x8xf32>, vector<16x8xf32>, vector<16x8xf32> -> vector<16x32xf32>
    %c0_29 = arith.constant 0 : index
    %c96 = arith.constant 96 : index
    %89 = vector.load %arg3[%c0_29, %c96] : memref<176x128xf32, #tpu.memory_space<vmem>>, vector<32x32xf32>
    %cst_30 = arith.constant dense<0.000000e+00> : vector<16x32xf32>
    %90 = tpu.matmul %88, %89, %cst_30 {dimension_numbers = #tpu.dot_dimension_numbers<[1], [0], [0], [1], [0, 0, 1, 1], [], []>, precision = #tpu.contract_precision<fp32>} : vector<16x32xf32>, vector<32x32xf32>, vector<16x32xf32> -> vector<16x32xf32>
    %91 = arith.addf %2, %90 : vector<16x32xf32>
    %c7 = arith.constant 7 : index
    %c0_31 = arith.constant 0 : index
    %92 = vector.load %arg2[%c7, %c0_31] : memref<16x128xf32, #tpu.memory_space<vmem>>, vector<1x32xf32>
    %93 = vector.broadcast %92 : vector<1x32xf32> to vector<16x32xf32>
    %94 = arith.addf %91, %93 : vector<16x32xf32>
    %c2 = arith.constant 2 : index
    %c0_32 = arith.constant 0 : index
    %95 = vector.load %arg2[%c2, %c0_32] : memref<16x128xf32, #tpu.memory_space<vmem>>, vector<1x32xf32>
    %c3 = arith.constant 3 : index
    %c0_33 = arith.constant 0 : index
    %96 = vector.load %arg2[%c3, %c0_33] : memref<16x128xf32, #tpu.memory_space<vmem>>, vector<1x32xf32>
    %cst_34 = arith.constant dense<0.000000e+00> : vector<16xf32>
    %97 = vector.multi_reduction <add>, %94, %cst_34 [1] : vector<16x32xf32> to vector<16xf32>
    %98 = vector.shape_cast %97 : vector<16xf32> to vector<16x1xf32>
    %cst_35 = arith.constant 3.200000e+01 : f32
    %99 = vector.broadcast %cst_35 : f32 to vector<16x1xf32>
    %100 = arith.divf %98, %99 : vector<16x1xf32>
    %101 = vector.broadcast %100 : vector<16x1xf32> to vector<16x32xf32>
    %102 = arith.subf %94, %101 : vector<16x32xf32>
    %103 = arith.mulf %102, %102 : vector<16x32xf32>
    %cst_36 = arith.constant dense<0.000000e+00> : vector<16xf32>
    %104 = vector.multi_reduction <add>, %103, %cst_36 [1] : vector<16x32xf32> to vector<16xf32>
    %105 = vector.shape_cast %104 : vector<16xf32> to vector<16x1xf32>
    %cst_37 = arith.constant 3.200000e+01 : f32
    %106 = vector.broadcast %cst_37 : f32 to vector<16x1xf32>
    %107 = arith.divf %105, %106 : vector<16x1xf32>
    %108 = vector.broadcast %100 : vector<16x1xf32> to vector<16x32xf32>
    %109 = arith.subf %94, %108 : vector<16x32xf32>
    %cst_38 = arith.constant 9.99999974E-6 : f32
    %110 = vector.broadcast %cst_38 : f32 to vector<16x1xf32>
    %111 = arith.addf %107, %110 : vector<16x1xf32>
    %112 = math.rsqrt %111 : vector<16x1xf32>
    %113 = vector.broadcast %112 : vector<16x1xf32> to vector<16x32xf32>
    %114 = arith.mulf %109, %113 : vector<16x32xf32>
    %115 = vector.broadcast %95 : vector<1x32xf32> to vector<16x32xf32>
    %116 = arith.mulf %114, %115 : vector<16x32xf32>
    %117 = vector.broadcast %96 : vector<1x32xf32> to vector<16x32xf32>
    %118 = arith.addf %116, %117 : vector<16x32xf32>
    %c32 = arith.constant 32 : index
    %c0_39 = arith.constant 0 : index
    %119 = vector.load %arg3[%c32, %c0_39] : memref<176x128xf32, #tpu.memory_space<vmem>>, vector<32x64xf32>
    %cst_40 = arith.constant dense<0.000000e+00> : vector<16x64xf32>
    %120 = tpu.matmul %118, %119, %cst_40 {dimension_numbers = #tpu.dot_dimension_numbers<[1], [0], [0], [1], [0, 0, 1, 1], [], []>, precision = #tpu.contract_precision<fp32>} : vector<16x32xf32>, vector<32x64xf32>, vector<16x64xf32> -> vector<16x64xf32>
    %c8 = arith.constant 8 : index
    %c0_41 = arith.constant 0 : index
    %121 = vector.load %arg2[%c8, %c0_41] : memref<16x128xf32, #tpu.memory_space<vmem>>, vector<1x64xf32>
    %122 = vector.broadcast %121 : vector<1x64xf32> to vector<16x64xf32>
    %123 = arith.addf %120, %122 : vector<16x64xf32>
    %124 = arith.mulf %123, %123 : vector<16x64xf32>
    %125 = arith.mulf %123, %124 : vector<16x64xf32>
    %cst_42 = arith.constant 4.471500e-02 : f32
    %126 = vector.broadcast %cst_42 : f32 to vector<16x64xf32>
    %127 = arith.mulf %126, %125 : vector<16x64xf32>
    %128 = arith.addf %123, %127 : vector<16x64xf32>
    %cst_43 = arith.constant 0.797884583 : f32
    %129 = vector.broadcast %cst_43 : f32 to vector<16x64xf32>
    %130 = arith.mulf %129, %128 : vector<16x64xf32>
    %131 = math.tanh %130 : vector<16x64xf32>
    %cst_44 = arith.constant 1.000000e+00 : f32
    %132 = vector.broadcast %cst_44 : f32 to vector<16x64xf32>
    %133 = arith.addf %132, %131 : vector<16x64xf32>
    %cst_45 = arith.constant 5.000000e-01 : f32
    %134 = vector.broadcast %cst_45 : f32 to vector<16x64xf32>
    %135 = arith.mulf %134, %133 : vector<16x64xf32>
    %136 = arith.mulf %123, %135 : vector<16x64xf32>
    %c64 = arith.constant 64 : index
    %c0_46 = arith.constant 0 : index
    %137 = vector.load %arg3[%c64, %c0_46] : memref<176x128xf32, #tpu.memory_space<vmem>>, vector<64x32xf32>
    %cst_47 = arith.constant dense<0.000000e+00> : vector<16x32xf32>
    %138 = tpu.matmul %136, %137, %cst_47 {dimension_numbers = #tpu.dot_dimension_numbers<[1], [0], [0], [1], [0, 0, 1, 1], [], []>, precision = #tpu.contract_precision<fp32>} : vector<16x64xf32>, vector<64x32xf32>, vector<16x32xf32> -> vector<16x32xf32>
    %139 = arith.addf %94, %138 : vector<16x32xf32>
    %c9 = arith.constant 9 : index
    %c0_48 = arith.constant 0 : index
    %140 = vector.load %arg2[%c9, %c0_48] : memref<16x128xf32, #tpu.memory_space<vmem>>, vector<1x32xf32>
    %141 = vector.broadcast %140 : vector<1x32xf32> to vector<16x32xf32>
    %142 = arith.addf %139, %141 : vector<16x32xf32>
    %c4 = arith.constant 4 : index
    %c0_49 = arith.constant 0 : index
    %143 = vector.load %arg2[%c4, %c0_49] : memref<16x128xf32, #tpu.memory_space<vmem>>, vector<1x32xf32>
    %c5 = arith.constant 5 : index
    %c0_50 = arith.constant 0 : index
    %144 = vector.load %arg2[%c5, %c0_50] : memref<16x128xf32, #tpu.memory_space<vmem>>, vector<1x32xf32>
    %cst_51 = arith.constant dense<0.000000e+00> : vector<16xf32>
    %145 = vector.multi_reduction <add>, %142, %cst_51 [1] : vector<16x32xf32> to vector<16xf32>
    %146 = vector.shape_cast %145 : vector<16xf32> to vector<16x1xf32>
    %cst_52 = arith.constant 3.200000e+01 : f32
    %147 = vector.broadcast %cst_52 : f32 to vector<16x1xf32>
    %148 = arith.divf %146, %147 : vector<16x1xf32>
    %149 = vector.broadcast %148 : vector<16x1xf32> to vector<16x32xf32>
    %150 = arith.subf %142, %149 : vector<16x32xf32>
    %151 = arith.mulf %150, %150 : vector<16x32xf32>
    %cst_53 = arith.constant dense<0.000000e+00> : vector<16xf32>
    %152 = vector.multi_reduction <add>, %151, %cst_53 [1] : vector<16x32xf32> to vector<16xf32>
    %153 = vector.shape_cast %152 : vector<16xf32> to vector<16x1xf32>
    %cst_54 = arith.constant 3.200000e+01 : f32
    %154 = vector.broadcast %cst_54 : f32 to vector<16x1xf32>
    %155 = arith.divf %153, %154 : vector<16x1xf32>
    %156 = vector.broadcast %148 : vector<16x1xf32> to vector<16x32xf32>
    %157 = arith.subf %142, %156 : vector<16x32xf32>
    %cst_55 = arith.constant 9.99999974E-6 : f32
    %158 = vector.broadcast %cst_55 : f32 to vector<16x1xf32>
    %159 = arith.addf %155, %158 : vector<16x1xf32>
    %160 = math.rsqrt %159 : vector<16x1xf32>
    %161 = vector.broadcast %160 : vector<16x1xf32> to vector<16x32xf32>
    %162 = arith.mulf %157, %161 : vector<16x32xf32>
    %163 = vector.broadcast %143 : vector<1x32xf32> to vector<16x32xf32>
    %164 = arith.mulf %162, %163 : vector<16x32xf32>
    %165 = vector.broadcast %144 : vector<1x32xf32> to vector<16x32xf32>
    %166 = arith.addf %164, %165 : vector<16x32xf32>
    %c128 = arith.constant 128 : index
    %c0_56 = arith.constant 0 : index
    %167 = vector.load %arg3[%c128, %c0_56] : memref<176x128xf32, #tpu.memory_space<vmem>>, vector<32x128xf32>
    %cst_57 = arith.constant dense<0.000000e+00> : vector<16x128xf32>
    %168 = tpu.matmul %166, %167, %cst_57 {dimension_numbers = #tpu.dot_dimension_numbers<[1], [0], [0], [1], [0, 0, 1, 1], [], []>, precision = #tpu.contract_precision<fp32>} : vector<16x32xf32>, vector<32x128xf32>, vector<16x128xf32> -> vector<16x128xf32>
    %c10 = arith.constant 10 : index
    %c0_58 = arith.constant 0 : index
    %169 = vector.load %arg2[%c10, %c0_58] : memref<16x128xf32, #tpu.memory_space<vmem>>, vector<1x128xf32>
    %170 = vector.broadcast %169 : vector<1x128xf32> to vector<16x128xf32>
    %171 = arith.addf %168, %170 : vector<16x128xf32>
    %c0_59 = arith.constant 0 : index
    %c0_60 = arith.constant 0 : index
    %172 = vector.load %arg4[%c0_59, %c0_60] : memref<16x128xf32, #tpu.memory_space<vmem>>, vector<16x128xf32>
    tpu.vector_store %arg4[%c0_59, %c0_60], %171 {strides = array<i32>} : memref<16x128xf32, #tpu.memory_space<vmem>>, vector<16x128xf32>,
    return
  }
  func.func @transform_0(%arg0: i32) -> (i32, i32) {
    %c0_i32 = arith.constant 0 : i32
    %c0_i32_0 = arith.constant 0 : i32
    return %arg0, %c0_i32 : i32, i32
  }
  func.func @transform_1(%arg0: i32) -> (i32, i32) {
    %c0_i32 = arith.constant 0 : i32
    %c0_i32_0 = arith.constant 0 : i32
    %c0_i32_1 = arith.constant 0 : i32
    return %c0_i32, %c0_i32_0 : i32, i32
  }
  func.func @transform_2(%arg0: i32) -> (i32, i32) {
    %c0_i32 = arith.constant 0 : i32
    %c0_i32_0 = arith.constant 0 : i32
    %c0_i32_1 = arith.constant 0 : i32
    return %c0_i32, %c0_i32_0 : i32, i32
  }
  func.func @transform_3(%arg0: i32) -> (i32, i32) {
    %c0_i32 = arith.constant 0 : i32
    %c0_i32_0 = arith.constant 0 : i32
    return %arg0, %c0_i32 : i32, i32
  }
}

</mosaic_0001>

<bundles_post_ra>
// kernel: vit_decoder_forward.1
= control target key start
LH: loop header
LB: loop body
LE: loop exit
PB: predicated region body
PF: predicated region fallthrough
CT: control target
= control target key end

     0   :  { %8 = vsyncpa [#allocation3], 0  ;;  %s9963_s0 = inlined_call_operand.hbm [shape: f32[32,32], index: 0, kind: input, shape index: {}]   ;;  %s9964_s1 = inlined_call_operand.hbm [shape: f32[16,128], index: 1, kind: input, shape index: {}]   ;;  %s9965_s2 = inlined_call_operand.hbm [shape: f32[176,128], index: 2, kind: input, shape index: {}]   ;;  %s9966_s3 = inlined_call_operand.vmem [shape: f32[32,128], index: 3, kind: output, shape index: {}]  }
   0x1   :  { %10 = vsyncpa [#allocation3 + $0x1], 0 }
   0x2   :  { %11 = vsyncpa [#allocation5], 0  ;;  %s8923_s12 = smov 0   ;;  %s8925_s13 = smov 0  }
   0x3   :  { %s8927_s14 = smov 0   ;;  %s8929_s15 = smov 0  }
   0x4 LB: > { %s7495_s16 = sadd.s32 4294967295, %s8881_s15   ;;  %p37_p0 = scmp.ne.s32.totalorder %s8873_s13, %s8869_s12  ;;  %s8881_s15 = sphi %s8929_s15, %s9982_s15   ;;  %s8877_s14 = sphi %s8927_s14, %s9981_s14   ;;  %s8873_s13 = sphi %s8925_s13, %s9980_s13   ;;  %s8869_s12 = sphi %s8923_s12, %s9979_s12  }
   0x5   : > { %p8945_p1 = scmp.eq.s32.totalorder %s7495_s16, 0  ;;  %p7497_p2 = scmp.ge.s32.totalorder %s8881_s15, 1 }
   0x6   : > { %p116_p3 = scmp.lt.s32.totalorder %s8881_s15, 3  ;;  %s8883_s20 = smov [#allocation4]  }
   0x7   : > { %s9971_s17 = scalar_select %p8945_p1, 1, 0 }
   0x8   : > { %p8953_p4 = por %p8945_p1, %p37_p0  ;;  %p8957_p5 = pnand %p7497_p2, %p116_p3 }
   0x9   : > { %s128_s21 = sshll.u32 %s8883_s20, 4  ;;  %s8884_s23 = smov [#allocation6]   ;;  %s129_s21 = int_to_ptr.vmem [resolvable:$true] %s128_s21 }
   0xa   : > { %s9972_s18 = scalar_select %p8953_p4, 1, 0 }
   0xb   : > { %s9973_s19 = scalar_select %p8957_p5, 1, 0 }
   0xc   : > { %p8644_p6 = pneg %p8957_p5  ;;  %s141_s24 = sshll.u32 %s8884_s23, 4  ;;  %s142_s24 = int_to_ptr.vmem [resolvable:$true] %s141_s24 }
   0xd   : > { %s8774_s25 = scalar_lea.vmem %s129_s21, 256  ;;  %p8782_p12 = scmp.lt.s32.totalorder %s129_s21, %s129_s21 }
   0xe   : > { %p8965_p7 = pnand %p8644_p6, %p8945_p1  ;;  %p8775_p9 = scmp.ne.s32.totalorder %s129_s21, %s8774_s25 }
   0xf   : > { %p8783_p13 = scmp.lt.s32.totalorder %s8774_s25, %s8774_s25 }
  0x10   : > { %p8765_p8 = pneg %p8965_p7 }
  0x11   : > { %p8784_p0 = por %p8783_p13, %p8782_p12 }
  0x12   : > { %p8777_p10 = pnand %p8775_p9, %p8765_p8 }
  0x14   : > { %p8778_p11 = pneg %p8777_p10 }
  0x16   : > { %p8785_p2 = pnand %p8784_p0, %p8778_p11 }
  0x18   : > { %8788 = shalt.err (!%p8785_p2)
}
  0x19   : > { %s8885_s26 = smov 128   ;;  %s8886_s27 = smov 8  }
  0x1a   : > { %8647 = dma.hbm_to_vmem [thread:$0]  (!%p8965_p7), %s9964_s1, 256, %s129_s21, [#allocation5], %s8885_s26, %s8885_s26, %s8886_s27  }
  0x1b   : > { %s8800_s30 = scalar_lea.vmem %s142_s24, 2816  ;;  %p8808_p10 = scmp.lt.s32.totalorder %s142_s24, %s142_s24 }
  0x1c   : > { %p8801_p3 = scmp.ne.s32.totalorder %s142_s24, %s8800_s30  ;;  %p8809_p11 = scmp.lt.s32.totalorder %s8800_s30, %s8800_s30 }
  0x1e   : > { %p8803_p6 = pnand %p8801_p3, %p8765_p8  ;;  %p8810_p12 = por %p8809_p11, %p8808_p10 }
  0x20   : > { %p8804_p9 = pneg %p8803_p6 }
  0x22   : > { %p8811_p13 = pnand %p8810_p12, %p8804_p9 }
  0x24   : > { %8814 = shalt.err (!%p8811_p13)
}
  0x25   : > { %8650 = dma.hbm_to_vmem [thread:$0]  (!%p8965_p7), %s9965_s2, 2816, %s142_s24, [#allocation5], %s8885_s26, %s8885_s26, %s8886_s27  }
  0x26   : > { %s8994_s6 = sadd.s32 1, %s8881_s15   ;;  %s24_s7 = sadd.s32 1, %s8877_s14 }
  0x27   : > { %s21_s8 = ssub.s32 %s8881_s15, %s8994_s6  ;;  %p31_p8 = scmp.ne.s32.totalorder %s8877_s14, %s8873_s13 }
  0x28   : > { %p22_p0 = scmp.eq.s32.totalorder %s21_s8, 0  ;;  %p32_p2 = scmp.eq.s32.totalorder %s8881_s15, 0 }
  0x29   : > { %p8657_p3 = scmp.lt.s32.totalorder %s8881_s15, 2  ;;  %s155_s9 = sand.u32 1, %s8877_s14  }
  0x2a   : > { %s9005_s10 = scalar_select %p22_p0, %s8877_s14, %s24_s7  }
  0x2b   : > { %p33_p6 = por %p32_p2, %p31_p8  ;;  %s7501_s11 = sshll.u32 %s155_s9, 4 }
  0x2c   : > { %s7523_s12 = sshll.u32 %s8881_s15, 8  ;;  %s159_s23 = scalar_lea.vmem [#allocation2], %s7501_s11 }
  0x2d   : > { %s9011_s22 = scalar_lea.hbm %s9963_s0, %s7523_s12  ;;  %s166_s24 = sshll.u32 %s159_s23, 4  ;;  %s9017_s24 = int_to_ptr.vmem [resolvable:$true] %s166_s24 }
  0x2e   : > { %p9013_p7 = pnand %p8657_p3, %p33_p6  ;;  %s9019_s28 = scalar_lea.sflag [#allocation3], %s155_s9 }
  0x2f   : > { %s8815_s29 = scalar_lea.hbm %s9011_s22, 256  ;;  %s8820_s5 = scalar_lea.hbm %s9963_s0, 512 }
  0x30   : > { %p8816_p9 = scmp.ne.s32.totalorder %s9011_s22, %s8815_s29  ;;  %p8817_p10 = pneg %p9013_p7 }
  0x31   : > { %p8821_p13 = scmp.lt.s32.totalorder %s9011_s22, %s9963_s0  ;;  %p8822_p8 = scmp.lt.s32.totalorder %s8820_s5, %s8815_s29 }
  0x32   : > { %p8818_p11 = pnand %p8817_p10, %p8816_p9 }
  0x33   : > { %p8823_p0 = por %p8822_p8, %p8821_p13 }
  0x34   : > { %p8819_p12 = pneg %p8818_p11 }
  0x36   : > { %p8824_p2 = pnand %p8823_p0, %p8819_p12 }
  0x38   : > { %8827 = shalt.err (!%p8824_p2)
}
  0x39   : > { %s8828_s9 = scalar_lea.vmem %s9017_s24, 256  ;;  %s8887_s11 = smov [#allocation2]  }
  0x3a   : > { %p8829_p3 = scmp.ne.s32.totalorder %s9017_s24, %s8828_s9  ;;  %s8833_s12 = sshll.u32 %s8887_s11, 4  ;;  %s8834_s12 = int_to_ptr.vmem [resolvable:$false] %s8833_s12 }
  0x3b   : > { %s8835_s20 = scalar_lea.vmem %s8834_s12, 512  ;;  %p8836_p11 = scmp.lt.s32.totalorder %s9017_s24, %s8834_s12 }
  0x3c   : > { %p8831_p6 = pnand %p8829_p3, %p8817_p10  ;;  %p8837_p1 = scmp.lt.s32.totalorder %s8835_s20, %s8828_s9 }
  0x3e   : > { %p8832_p9 = pneg %p8831_p6  ;;  %p8838_p4 = por %p8837_p1, %p8836_p11 }
  0x40   : > { %p8839_p5 = pnand %p8838_p4, %p8832_p9 }
  0x42   : > { %8842 = shalt.err (!%p8839_p5)
}
  0x43   : > { %8654 = dma.hbm_to_vmem [thread:$0]  (!%p9013_p7), %s9011_s22, 256, %s9017_s24, %s9019_s28, %s8885_s26, %s8885_s26, %s8886_s27  }
  0x44   : > { %p9976_p10 = scmp.ne.s32.totalorder %s9973_s19, 0 }
  0x45   : > { %s180_s21 = sand.u32 (!%p9976_p10), 1, %s8873_s13   ;;  %p9977_p1 = scmp.ne.s32.totalorder (!%p9976_p10), %s9972_s18, 0 }
  0x46   : > { %178 = sbr.rel (%p9976_p10) target bundleno = 4885 (0x1315), region = 32  ;;  %s7505_s23 = sshll.u32 (!%p9976_p10), %s180_s21, 4 }
  0x47   : > { %s181_s29 = scalar_lea.sflag (!%p9976_p10), [#allocation3], %s180_s21  ;;  %s184_s30 = scalar_lea.vmem (!%p9976_p10), [#allocation2], %s7505_s23 }
  0x4b   : > { %8860 = dma.done.wait (%p9977_p1), %s181_s29, 256  }
  0x4c   : > { %8862 = vsyncadd (%p9977_p1), %s181_s29, 4294967040  ;;  %p9978_p4 = scmp.ne.s32.totalorder %s9971_s17, 0 }
  0x4e   : > { %8864 = dma.done.wait (%p9978_p4), [#allocation5], 3072  }
  0x4f   : > { %8866 = vsyncadd (%p9978_p4), [#allocation5], 4294964224  ;;  %v222_v0 = vld [vmem:[%s184_s30] sm:$0xff]  ;;  %vm230_vm0 = vcmask 261120   ;;  %v223_v2 = vld [vmem:[%s184_s30 + $0x8] sm:$0xff]  ;;  %s8888_s17 = smov 96  }
  0x50   : > { %v224_v1 = vld [vmem:[#allocation6 + $0xa0] sm:$0xff]  ;;  %v225_v4 = vld [vmem:[#allocation6 + $0xa8] sm:$0xff]  ;;  %v273_v18 = vld [vmem:[#allocation6 + $0x18] sm:$0xff]  ;;  %vm819_vm1 = vcmask 64512   ;;  %vm1330_vm2 = vcmask 130048   ;;  %s8889_s18 = smov 64  }
  0x51   : > { %v9054_v3 = vadd.f32 %v224_v1, %v222_v0  ;;  %v9056_v5 = vadd.f32 %v225_v4, %v223_v2  ;;  %v272_v19 = vld [vmem:[#allocation6 + $0x10] sm:$0xff]  ;;  %v271_v20 = vld [vmem:[#allocation6 + $0x8] sm:$0xff]  ;;  %v9070_v21 = vand.u32 4294901760, %v273_v18  ;;  %v270_v35 = vld [vmem:[#allocation6] sm:$0xff]  ;;  %s8890_s19 = smov 88   ;;  %s8891_s26 = smov 120  }
  0x52   : > { %v9072_v22 = vand.u32 4294901760, %v272_v19  ;;  %v9074_v23 = vand.u32 4294901760, %v271_v20  ;;  %v9106_v36 = vand.u32 4294901760, %v270_v35  ;;  %v7510_v49 = vld [vmem:[#allocation4] ss:$0 sm:$0xff]  ;;  %s8892_s27 = smov 56  }
  0x53   : > { %v231_v6 = vsel %vm230_vm0, %v9054_v3, 0.0  ;;  %v234_v7 = vsel %vm230_vm0, %v9056_v5, 0.0  ;;  %v9077_v24 = vsub.f32 %v273_v18, %v9070_v21  ;;  %7920 = vmatprep.subr.mxu0 %v9070_v21  ;;  %v7511_v51 = vld [vmem:[#allocation4 + $0x1] ss:$0 sm:$0xff]  ;;  %s8893_s22 = smov 80   ;;  %s8894_s24 = smov 112  }
  0x54   : > { %232 = vadd.xlane.f32.xlu0 %v231_v6  ;;  %v9080_v25 = vsub.f32 %v272_v19, %v9072_v22  ;;  %v9083_v26 = vsub.f32 %v271_v20, %v9074_v23  ;;  %7921 = vmatpush3.msra.mxu0 %v9070_v21  ;;  %v9109_v38 = vsub.f32 %v270_v35, %v9106_v36  ;;  %s8895_s25 = smov 48   ;;  %s8896_s28 = smov 72   ;;  %vm5057_vm3 = vcmask 195584  }
  0x55   : > { %v9088_v27 = vand.u32 4294901760, %v9077_v24  ;;  %7922 = vmatprep.subr.mxu0 %v9072_v22  ;;  %s8897_s4 = smov 104   ;;  %s8898_s5 = smov 40   ;;  %vm6228_vm4 = vcmask 523264  }
  0x56   : > { %v9091_v28 = vand.u32 4294901760, %v9080_v25  ;;  %v9094_v29 = vand.u32 4294901760, %v9083_v26  ;;  %7923 = vmatpush3.msra.mxu0 %v9072_v22  ;;  %v9114_v39 = vand.u32 4294901760, %v9109_v38  ;;  %s8899_s7 = smov 32   ;;  %s8900_s8 = smov 8  }
  0x57   : > { %v402_v30 = vsub.f32 %v9077_v24, %v9088_v27  ;;  %7924 = vmatprep.subr.mxu0 %v9074_v23  ;;  %s8901_s9 = smov 16   ;;  %s8902_s11 = smov 24  }
  0x58   : > { %235 = vadd.xlane.f32.xlu0 %v234_v7  ;;  %v409_v31 = vsub.f32 %v9080_v25, %v9091_v28  ;;  %v416_v32 = vsub.f32 %v9083_v26, %v9094_v29  ;;  %7925 = vmatpush3.msra.mxu0 %v9074_v23  ;;  %v423_v40 = vsub.f32 %v9109_v38, %v9114_v39  ;;  %s7508_s12 = sshll.u32 %s7495_s16, 1 }
  0x59   : > { %v403_v33 = vand.u32 4294901760, %v402_v30  ;;  %7926 = vmatprep.subr.mxu0 %v9106_v36  ;;  %p217_p5 = scmp.lt.s32.totalorder %s7508_s12, 3 }
  0x5a   : > { %v410_v34 = vand.u32 4294901760, %v409_v31  ;;  %v417_v37 = vand.u32 4294901760, %v416_v32  ;;  %7927 = vmatpush3.msra.mxu0 %v9106_v36  ;;  %v424_v41 = vand.u32 4294901760, %v423_v40 }
  0x5b   : > { %7931 = vmatprep.subr.mxu1 %v403_v33  ;;  %7942 = vmatprep.subr.mxu0 %v9077_v24  ;;  %s9984_s12 = smov (!%p217_p5, %s7508_s12), 3 }
  0x5c   : > { %7932 = vmatpush3.msra.mxu1 %v403_v33  ;;  %s7509_s20 = sshll.u32 %s9984_s12, 3 }
  0x5d   : > { %7933 = vmatprep.subr.mxu1 %v410_v34  ;;  %s220_s21 = scalar_lea.vmem %s9966_s3, %s7509_s20 }
  0x5e   : > { %7934 = vmatpush3.msra.mxu1 %v410_v34 }
  0x5f   : > { %7935 = vmatprep.subr.mxu1 %v417_v37 }
  0x60   : > { %7936 = vmatpush3.msra.mxu1 %v417_v37 }
  0x61   : > { %7937 = vmatprep.subr.mxu1 %v424_v41 }
  0x62   : > { %7938 = vmatpush3.msra.mxu1 %v424_v41 }
  0x63   : > { %7953 = vmatprep.subr.mxu1 %v9070_v21 }
  0xdd   : > { %v233_v8 = vpop.xlane.xlu0 %232 }
  0xde   : > { %v238_v9 = vmul.f32 0.03125, %v233_v8 }
  0xe0   : > { %v240_v10 = vsub.f32 %v9054_v3, %v238_v9  ;;  %v7512_v9 = vld [vmem:[#allocation4 + $0x6] ss:$0 sm:$0xff] }
  0xe1   : > { %v236_v11 = vpop.xlane.xlu0 %235 }
  0xe2   : > { %v239_v12 = vmul.f32 0.03125, %v236_v11  ;;  %v242_v13 = vmul.f32 %v240_v10, %v240_v10 }
  0xe4   : > { %v9064_v14 = vsub.f32 %v9056_v5, %v239_v12  ;;  %v244_v15 = vsel %vm230_vm0, %v242_v13, 0.0 }
  0xe5   : > { %245 = vadd.xlane.f32.xlu1 %v244_v15 }
  0xe6   : > { %v243_v16 = vmul.f32 %v9064_v14, %v9064_v14 }
  0xe8   : > { %v247_v17 = vsel %vm230_vm0, %v243_v16, 0.0 }
  0xe9   : > { %248 = vadd.xlane.f32.xlu1 %v247_v17 }
 0x16e   : > { %v246_v42 = vpop.xlane.xlu1 %245 }
 0x16f   : > { %v250_v43 = vmul.f32 0.03125, %v246_v42 }
 0x171   : > { %v252_v44 = vadd.f32 1e-05, %v250_v43 }
 0x172   : > { %v249_v45 = vpop.xlane.xlu1 %248 }
 0x173   : > { %8711 = vrsqrt.f32 %v252_v44  ;;  %v251_v46 = vmul.f32 0.03125, %v249_v45 }
 0x175   : > { %v253_v47 = vadd.f32 1e-05, %v251_v46 }
 0x177   : > { %8713 = vrsqrt.f32 %v253_v47 }
 0x180   : > { %v8712_v48 = vpop.eup %8711 }
 0x181   : > { %v256_v50 = vmul.f32 %v8712_v48, %v240_v10 }
 0x183   : > { %v262_v52 = vmul.f32 %v7510_v49, %v256_v50 }
 0x184   : > { %v8714_v53 = vpop.eup %8713 }
 0x185   : > { %v268_v54 = vadd.f32 %v7511_v51, %v262_v52  ;;  %v257_v55 = vmul.f32 %v8714_v53, %v9064_v14 }
 0x187   : > { %v280_v56 = vsel %vm230_vm0, %v268_v54, 0  ;;  %v263_v57 = vmul.f32 %v7510_v49, %v257_v55 }
 0x188   : > { %v354_v58 = vand.u32 4294901760, %v280_v56 }
 0x189   : > { %v269_v59 = vadd.f32 %v7511_v51, %v263_v57 }
 0x18a   : > { %7939 = vmatprep.mubr.f32.mxu1 %v354_v58  ;;  %v355_v60 = vsub.f32 %v280_v56, %v354_v58 }
 0x18b   : > { %v283_v61 = vsel %vm230_vm0, %v269_v59, 0 }
 0x18c   : > { %v364_v62 = vand.u32 4294901760, %v283_v61  ;;  %v356_v63 = vand.u32 4294901760, %v355_v60 }
 0x18e   : > { %v365_v0 = vsub.f32 %v283_v61, %v364_v62  ;;  %7940 = vmatmul.mubr.f32.vlgmr.msra.gmra.mxu1 %v364_v62  ;;  %v357_v1 = vsub.f32 %v355_v60, %v356_v63 }
 0x18f   : > { %7954 = vmatpush3.msra.mxu1 %v9070_v21  ;;  %7961 = vmatprep.mubr.f32.mxu1 %v356_v63 }
 0x190   : > { %7955 = vmatprep.subr.mxu1 %v9072_v22  ;;  %v358_v2 = vand.u32 4294901760, %v357_v1  ;;  %v366_v4 = vand.u32 4294901760, %v365_v0 }
 0x191   : > { %7956 = vmatpush3.msra.mxu1 %v9072_v22 }
 0x192   : > { %7957 = vmatprep.subr.mxu1 %v9074_v23  ;;  %7928 = vmatprep.mubr.f32.mxu0 %v358_v2  ;;  %v367_v6 = vsub.f32 %v365_v0, %v366_v4 }
 0x193   : > { %7958 = vmatpush3.msra.mxu1 %v9074_v23 }
 0x194   : > { %7959 = vmatprep.subr.mxu1 %v9106_v36  ;;  %v368_v7 = vand.u32 4294901760, %v367_v6 }
 0x195   : > { %7960 = vmatpush3.msra.mxu1 %v9106_v36 }
 0x196   : > { %7962 = vmatmul.mubr.f32.vlgmr.msra.gmra.mxu1 %v366_v4  ;;  %7975 = vmatprep.subr.mxu1 %v9070_v21 }
 0x197   : > { %7929 = vmatmul.mubr.f32.vlgmr.msra.gmra.mxu0 %v368_v7  ;;  %7976 = vmatpush3.msra.mxu1 %v9070_v21 }
 0x198   : > { %7943 = vmatpush3.msra.mxu0 %v9077_v24  ;;  %7983 = vmatprep.mubr.f32.mxu1 %v354_v58 }
 0x199   : > { %7944 = vmatprep.subr.mxu0 %v9080_v25  ;;  %7950 = vmatprep.mubr.f32.mxu0 %v355_v60 }
 0x19a   : > { %7977 = vmatprep.subr.mxu1 %v9072_v22  ;;  %7945 = vmatpush3.msra.mxu0 %v9080_v25 }
 0x19b   : > { %7978 = vmatpush3.msra.mxu1 %v9072_v22  ;;  %7946 = vmatprep.subr.mxu0 %v9083_v26 }
 0x19c   : > { %7979 = vmatprep.subr.mxu1 %v9074_v23  ;;  %7947 = vmatpush3.msra.mxu0 %v9083_v26 }
 0x19d   : > { %7980 = vmatpush3.msra.mxu1 %v9074_v23  ;;  %7948 = vmatprep.subr.mxu0 %v9109_v38 }
 0x19e   : > { %7981 = vmatprep.subr.mxu1 %v9106_v36  ;;  %7949 = vmatpush3.msra.mxu0 %v9109_v38 }
 0x19f   : > { %7982 = vmatpush3.msra.mxu1 %v9106_v36  ;;  %7951 = vmatmul.mubr.f32.vlgmr.msra.gmra.mxu0 %v365_v0 }
 0x1a0   : > { %7964 = vmatprep.subr.mxu0 %v9088_v27  ;;  %7984 = vmatmul.mubr.f32.vlgmr.msra.gmra.mxu1 %v364_v62 }
 0x1a1   : > { %7965 = vmatpush3.msra.mxu0 %v9088_v27  ;;  %7972 = vmatprep.mubr.f32.mxu0 %v354_v58 }
 0x1a2   : > { %7966 = vmatprep.subr.mxu0 %v9091_v28 }
 0x1a3   : > { %7967 = vmatpush3.msra.mxu0 %v9091_v28 }
 0x1a4   : > { %7968 = vmatprep.subr.mxu0 %v9094_v29 }
 0x1a5   : > { %7969 = vmatpush3.msra.mxu0 %v9094_v29 }
 0x1a6   : > { %7970 = vmatprep.subr.mxu0 %v9114_v39 }
 0x1a7   : > { %7971 = vmatpush3.msra.mxu0 %v9114_v39 }
 0x1a8   : > { %7973 = vmatmul.mubr.f32.vlgmr.msra.gmra.mxu0 %v364_v62 }
 0x24e   : > { %v7941_v10 = vpop.f32.mrf.mxu1 }
 0x250   : > { %v461_v15 = vpop.f32.mrf.mxu1 }
 0x256   : > { %v7963_v17 = vpop.f32.mrf.mxu1 }
 0x257   : > { %v7930_v8 = vpop.f32.mrf.mxu0 }
 0x258   : > { %v371_v12 = vadd.f32 %v7930_v8, %v7512_v9  ;;  %v631_v22 = vpop.f32.mrf.mxu1 }
 0x259   : > { %v360_v11 = vpop.f32.mrf.mxu0 }
 0x25a   : > { %v361_v13 = vadd.f32 %v7512_v9, %v360_v11  ;;  %v468_v16 = vadd.f32 %v7941_v10, %v371_v12 }
 0x25c   : > { %v462_v20 = vadd.f32 %v461_v15, %v361_v13 }
 0x25f   : > { %v7952_v14 = vpop.f32.mrf.mxu0 }
 0x260   : > { %v555_v19 = vadd.f32 %v7952_v14, %v468_v16  ;;  %v7985_v24 = vpop.f32.mrf.mxu1 }
 0x261   : > { %v547_v18 = vpop.f32.mrf.mxu0 }
 0x262   : > { %v548_v21 = vadd.f32 %v547_v18, %v462_v20  ;;  %v640_v23 = vadd.f32 %v7963_v17, %v555_v19  ;;  %v803_v31 = vpop.f32.mrf.mxu1 }
 0x264   : > { %v632_v27 = vadd.f32 %v631_v22, %v548_v21 }
 0x268   : > { %v7974_v25 = vpop.f32.mrf.mxu0 }
 0x269   : > { %v729_v26 = vadd.f32 %v7974_v25, %v640_v23 }
 0x26a   : > { %v722_v28 = vpop.f32.mrf.mxu0 }
 0x26b   : > { %v9153_v29 = vadd.f32 %v7985_v24, %v729_v26  ;;  %v723_v30 = vadd.f32 %v722_v28, %v632_v27 }
 0x26d   : > { %v9155_v32 = vadd.f32 %v803_v31, %v723_v30  ;;  %817 = vrot.lane.b32.xlu0 %v9153_v29, %s8888_s17  ;;  %v822_v39 = vsel %vm819_vm1, %v9153_v29, 0 }
 0x26e   : > { %v905_v40 = vand.u32 4294901760, %v822_v39 }
 0x26f   : > { %815 = vrot.lane.b32.xlu1 %v9155_v32, %s8888_s17  ;;  %v820_v33 = vsel %vm819_vm1, %v9155_v32, 0 }
 0x270   : > { %v895_v34 = vand.u32 4294901760, %v820_v33  ;;  %v906_v41 = vsub.f32 %v822_v39, %v905_v40 }
 0x272   : > { %7997 = vmatprep.mubr.f32.mxu1 %v895_v34  ;;  %v896_v35 = vsub.f32 %v820_v33, %v895_v34  ;;  %v907_v46 = vand.u32 4294901760, %v906_v41 }
 0x274   : > { %v897_v36 = vand.u32 4294901760, %v896_v35  ;;  %v908_v51 = vsub.f32 %v906_v41, %v907_v46 }
 0x276   : > { %v898_v37 = vsub.f32 %v896_v35, %v897_v36  ;;  %v909_v55 = vand.u32 4294901760, %v908_v51 }
 0x278   : > { %v899_v38 = vand.u32 4294901760, %v898_v37 }
 0x27a   : > { %7990 = vmatprep.mubr.f32.mxu0 %v899_v38 }
 0x2df   : > { %v818_v42 = vpop.permute.xlu0 %817 }
 0x2e0   : > { %v826_v43 = vsel %vm819_vm1, %v818_v42, 0 }
 0x2e1   : > { %v857_v44 = vand.u32 4294901760, %v826_v43  ;;  %v816_v45 = vpop.permute.xlu1 %815 }
 0x2e2   : > { %v824_v47 = vsel %vm819_vm1, %v816_v45, 0 }
 0x2e3   : > { %v945_v48 = vsub.f32 %v826_v43, %v857_v44  ;;  %v860_v49 = vand.u32 4294901760, %v824_v47  ;;  %7986 = vmatprep.subr.mxu0 %v857_v44 }
 0x2e4   : > { %7987 = vmatpush3.xpose.msra.mxu0 %v857_v44 }
 0x2e5   : > { %v952_v50 = vsub.f32 %v824_v47, %v860_v49  ;;  %7988 = vmatprep.subr.mxu0 %v860_v49  ;;  %v946_v52 = vand.u32 4294901760, %v945_v48 }
 0x2e7   : > { %v947_v53 = vsub.f32 %v945_v48, %v946_v52  ;;  %v953_v54 = vand.u32 4294901760, %v952_v50 }
 0x2e8   : > { %7989 = vmatpush3.xpose.msra.mxu0 %v860_v49 }
 0x2e9   : > { %8000 = vmatprep.subr.mxu0 %v945_v48  ;;  %v948_v56 = vand.u32 4294901760, %v947_v53  ;;  %v954_v57 = vsub.f32 %v952_v50, %v953_v54 }
 0x2eb   : > { %7991 = vmatmul.mubr.f32.vlgmr.msra.gmra.mxu0 %v909_v55  ;;  %7993 = vmatprep.subr.mxu1 %v948_v56  ;;  %v955_v58 = vand.u32 4294901760, %v954_v57 }
 0x2ec   : > { %7994 = vmatpush3.xpose.msra.mxu1 %v948_v56  ;;  %8001 = vmatpush3.xpose.msra.mxu0 %v945_v48 }
 0x2ed   : > { %8004 = vmatprep.mubr.f32.mxu0 %v896_v35  ;;  %7995 = vmatprep.subr.mxu1 %v955_v58 }
 0x2ee   : > { %8002 = vmatprep.subr.mxu0 %v952_v50 }
 0x2f0   : > { %7996 = vmatpush3.xpose.msra.mxu1 %v955_v58  ;;  %8003 = vmatpush3.xpose.msra.mxu0 %v952_v50 }
 0x2f1   : > { %8007 = vmatprep.subr.mxu1 %v857_v44  ;;  %8014 = vmatprep.subr.mxu0 %v946_v52 }
 0x2f3   : > { %7998 = vmatmul.mubr.f32.vlgmr.msra.gmra.mxu1 %v905_v40  ;;  %8005 = vmatmul.mubr.f32.vlgmr.msra.gmra.mxu0 %v906_v41 }
 0x2f4   : > { %8008 = vmatpush3.xpose.msra.mxu1 %v857_v44  ;;  %8011 = vmatprep.mubr.f32.mxu1 %v897_v36 }
 0x2f5   : > { %8015 = vmatpush3.xpose.msra.mxu0 %v946_v52  ;;  %8018 = vmatprep.mubr.f32.mxu0 %v895_v34 }
 0x2f6   : > { %8009 = vmatprep.subr.mxu1 %v860_v49  ;;  %8016 = vmatprep.subr.mxu0 %v953_v54 }
 0x2f8   : > { %8010 = vmatpush3.xpose.msra.mxu1 %v860_v49 }
 0x2f9   : > { %8017 = vmatpush3.xpose.msra.mxu0 %v953_v54  ;;  %8021 = vmatprep.subr.mxu1 %v857_v44 }
 0x2fb   : > { %8012 = vmatmul.mubr.f32.vlgmr.msra.gmra.mxu1 %v907_v46 }
 0x2fc   : > { %8019 = vmatmul.mubr.f32.vlgmr.msra.gmra.mxu0 %v905_v40  ;;  %8022 = vmatpush3.xpose.msra.mxu1 %v857_v44 }
 0x2fd   : > { %8025 = vmatprep.mubr.f32.mxu1 %v895_v34  ;;  %8023 = vmatprep.subr.mxu1 %v860_v49 }
 0x300   : > { %8024 = vmatpush3.xpose.msra.mxu1 %v860_v49 }
 0x303   : > { %8026 = vmatmul.mubr.f32.vlgmr.msra.gmra.mxu1 %v905_v40 }
 0x3ab   : > { %v7992_v59 = vpop.f32.mrf.mxu0 }
 0x3ad   : > { %v901_v61 = vpop.f32.mrf.mxu0 }
 0x3b3   : > { %v7999_v60 = vpop.f32.mrf.mxu1  ;;  %v8006_v0 = vpop.f32.mrf.mxu0 }
 0x3b4   : > { %v999_v63 = vadd.f32 %v7999_v60, %v7992_v59 }
 0x3b5   : > { %v992_v62 = vpop.f32.mrf.mxu1  ;;  %v1074_v6 = vpop.f32.mrf.mxu0 }
 0x3b6   : > { %v993_v1 = vadd.f32 %v992_v62, %v901_v61  ;;  %v1082_v4 = vadd.f32 %v8006_v0, %v999_v63 }
 0x3b8   : > { %v1075_v8 = vadd.f32 %v1074_v6, %v993_v1 }
 0x3bb   : > { %v8013_v2 = vpop.f32.mrf.mxu1 }
 0x3bc   : > { %v1165_v9 = vadd.f32 %v8013_v2, %v1082_v4  ;;  %v8020_v10 = vpop.f32.mrf.mxu0 }
 0x3bd   : > { %v1156_v7 = vpop.f32.mrf.mxu1 }
 0x3be   : > { %v1157_v11 = vadd.f32 %v1156_v7, %v1075_v8  ;;  %v1248_v12 = vadd.f32 %v8020_v10, %v1165_v9  ;;  %v1241_v13 = vpop.f32.mrf.mxu0 }
 0x3c0   : > { %v1242_v15 = vadd.f32 %v1241_v13, %v1157_v11 }
 0x3c3   : > { %v8027_v14 = vpop.f32.mrf.mxu1 }
 0x3c4   : > { %v1327_v16 = vadd.f32 %v8027_v14, %v1248_v12 }
 0x3c5   : > { %v1320_v17 = vpop.f32.mrf.mxu1 }
 0x3c6   : > { %v1321_v18 = vadd.f32 %v1320_v17, %v1242_v15  ;;  %v1334_v19 = vsel %vm1330_vm2, %v1327_v16, -inf }
 0x3c7   : > { %1335 = vmax.xlane.f32.xlu0 %v1334_v19 }
 0x3c8   : > { %v1331_v20 = vsel %vm1330_vm2, %v1321_v18, -inf }
 0x3c9   : > { %1332 = vmax.xlane.f32.xlu1 %v1331_v20 }
 0x450   : > { %v1336_v21 = vpop.xlane.xlu0 %1335 }
 0x451   : > { %v1338_v22 = vsub.f32 %v1327_v16, %v1336_v21 }
 0x452   : > { %v1333_v23 = vpop.xlane.xlu1 %1332 }
 0x453   : > { %v1341_v24 = vmul.f32 1.442695, %v1338_v22  ;;  %v1337_v25 = vsub.f32 %v1321_v18, %v1333_v23 }
 0x455   : > { %8715 = vpow2.f32 %v1341_v24  ;;  %v1339_v26 = vmul.f32 1.442695, %v1337_v25 }
 0x457   : > { %8717 = vpow2.f32 %v1339_v26 }
 0x462   : > { %v8716_v27 = vpop.eup %8715 }
 0x463   : > { %v1346_v28 = vsel %vm1330_vm2, %v8716_v27, 0.0 }
 0x464   : > { %v8718_v30 = vpop.eup %8717  ;;  %1347 = vadd.xlane.f32.xlu1 %v1346_v28 }
 0x465   : > { %v1343_v31 = vsel %vm1330_vm2, %v8718_v30, 0.0 }
 0x466   : > { %1344 = vadd.xlane.f32.xlu0 %v1343_v31 }
 0x475   : > { %1353 = vrot.lane.b32.xlu1 %v9155_v32, %s8889_s18 }
 0x479   : > { %1873 = vrot.lane.b32.xlu1 %v9153_v29, %s8890_s19 }
 0x47c   : > { %1355 = vrot.lane.b32.xlu0 %v9153_v29, %s8889_s18 }
 0x47d   : > { %1871 = vrot.lane.b32.xlu1 %v9155_v32, %s8890_s19 }
 0x480   : > { %1867 = vrot.lane.b32.xlu0 %v9155_v32, %s8891_s26 }
 0x481   : > { %1869 = vrot.lane.b32.xlu1 %v9153_v29, %s8891_s26 }
 0x4ed   : > { %v1348_v33 = vpop.xlane.xlu1 %1347 }
 0x4ee   : > { %8719 = vrcp.f32 %v1348_v33 }
 0x4ef   : > { %v1345_v34 = vpop.xlane.xlu0 %1344 }
 0x4f0   : > { %8721 = vrcp.f32 %v1345_v34 }
 0x4f1   : > { %v1354_v35 = vpop.permute.xlu1 %1353 }
 0x4f2   : > { %v9175_v36 = vand.u32 4294901760, %v1354_v35 }
 0x4f3   : > { %v1356_v37 = vpop.permute.xlu0 %1355 }
 0x4f4   : > { %v9178_v38 = vsub.f32 %v1354_v35, %v9175_v36  ;;  %v1394_v39 = vand.u32 4294901760, %v1356_v37 }
 0x4f5   : > { %v1874_v40 = vpop.permute.xlu1 %1873 }
 0x4f6   : > { %v9180_v41 = vsub.f32 %v1356_v37, %v1394_v39  ;;  %8028 = vmatprep.subr.mxu0 %v1394_v39  ;;  %v9183_v42 = vand.u32 4294901760, %v9178_v38  ;;  %v1881_v43 = vsel %vm819_vm1, %v1874_v40, 0 }
 0x4f7   : > { %8029 = vmatpush3.msra.mxu0 %v1394_v39  ;;  %v9191_v46 = vand.u32 4294901760, %v1881_v43  ;;  %v1868_v60 = vpop.permute.xlu0 %1867 }
 0x4f8   : > { %8030 = vmatprep.subr.mxu0 %v9175_v36  ;;  %v9188_v44 = vand.u32 4294901760, %v9180_v41  ;;  %v1491_v49 = vsub.f32 %v9178_v38, %v9183_v42  ;;  %v1875_v2 = vsel %vm819_vm1, %v1868_v60, 0 }
 0x4f9   : > { %8031 = vmatpush3.msra.mxu0 %v9175_v36  ;;  %v1872_v45 = vpop.permute.xlu1 %1871  ;;  %v9202_v55 = vsub.f32 %v1881_v43, %v9191_v46  ;;  %v9220_v9 = vand.u32 4294901760, %v1875_v2 }
 0x4fa   : > { %v1879_v47 = vsel %vm819_vm1, %v1872_v45, 0  ;;  %8042 = vmatprep.subr.mxu0 %v9180_v41  ;;  %v1484_v48 = vsub.f32 %v9180_v41, %v9188_v44  ;;  %v1492_v56 = vand.u32 4294901760, %v1491_v49 }
 0x4fb   : > { %v8720_v50 = vpop.eup %8719  ;;  %v9199_v54 = vand.u32 4294901760, %v1879_v47  ;;  %v9213_v1 = vand.u32 4294901760, %v9202_v55  ;;  %v1951_v17 = vsub.f32 %v1875_v2, %v9220_v9 }
 0x4fc   : > { %v1485_v51 = vand.u32 4294901760, %v1484_v48  ;;  %v1352_v52 = vmul.f32 %v8720_v50, %v8716_v27 }
 0x4fd   : > { %v8722_v53 = vpop.eup %8721  ;;  %v9209_v62 = vsub.f32 %v1879_v47, %v9199_v54  ;;  %v1870_v10 = vpop.permute.xlu1 %1869  ;;  %v2002_v11 = vsub.f32 %v9202_v55, %v9213_v1  ;;  %v1952_v22 = vand.u32 4294901760, %v1951_v17 }
 0x4fe   : > { %8035 = vmatprep.subr.mxu1 %v1485_v51  ;;  %v1350_v57 = vmul.f32 %v8722_v53, %v8718_v30  ;;  %v1363_v58 = vsel %vm1330_vm2, %v1352_v52, 0  ;;  %v1877_v14 = vsel %vm819_vm1, %v1870_v10, 0 }
 0x4ff   : > { %8036 = vmatpush3.msra.mxu1 %v1485_v51  ;;  %v9205_v59 = vand.u32 4294901760, %v1363_v58  ;;  %v9218_v8 = vand.u32 4294901760, %v9209_v62  ;;  %v2003_v18 = vand.u32 4294901760, %v2002_v11  ;;  %v1960_v20 = vand.u32 4294901760, %v1877_v14 }
 0x500   : > { %8037 = vmatprep.subr.mxu1 %v1492_v56  ;;  %v1360_v61 = vsel %vm1330_vm2, %v1350_v57, 0  ;;  %v1953_v24 = vsub.f32 %v1951_v17, %v1952_v22 }
 0x501   : > { %8038 = vmatpush3.msra.mxu1 %v1492_v56  ;;  %v1432_v63 = vand.u32 4294901760, %v1360_v61  ;;  %v1443_v0 = vsub.f32 %v1363_v58, %v9205_v59  ;;  %v2009_v16 = vsub.f32 %v9209_v62, %v9218_v8  ;;  %v1961_v23 = vsub.f32 %v1877_v14, %v1960_v20 }
 0x502   : > { %8049 = vmatprep.subr.mxu1 %v1394_v39  ;;  %v1954_v26 = vand.u32 4294901760, %v1953_v24 }
 0x503   : > { %8039 = vmatprep.mubr.f32.mxu1 %v1432_v63  ;;  %v1433_v4 = vsub.f32 %v1360_v61, %v1432_v63  ;;  %v1444_v6 = vand.u32 4294901760, %v1443_v0  ;;  %v2010_v21 = vand.u32 4294901760, %v2009_v16  ;;  %v1962_v25 = vand.u32 4294901760, %v1961_v23 }
 0x504   : > { %8040 = vmatmul.mubr.f32.vlgmr.msra.gmra.mxu1 %v9205_v59 }
 0x505   : > { %8050 = vmatpush3.msra.mxu1 %v1394_v39  ;;  %v1434_v7 = vand.u32 4294901760, %v1433_v4  ;;  %v1445_v12 = vsub.f32 %v1443_v0, %v1444_v6  ;;  %v1963_v27 = vsub.f32 %v1961_v23, %v1962_v25 }
 0x506   : > { %8051 = vmatprep.subr.mxu1 %v9175_v36 }
 0x507   : > { %8052 = vmatpush3.msra.mxu1 %v9175_v36  ;;  %8053 = vmatprep.mubr.f32.mxu1 %v1434_v7  ;;  %v1435_v13 = vsub.f32 %v1433_v4, %v1434_v7  ;;  %v1446_v19 = vand.u32 4294901760, %v1445_v12  ;;  %v1964_v28 = vand.u32 4294901760, %v1963_v27 }
 0x508   : > { %8063 = vmatprep.subr.mxu1 %v1394_v39  ;;  %8054 = vmatmul.mubr.f32.vlgmr.msra.gmra.mxu1 %v1444_v6 }
 0x509   : > { %8064 = vmatpush3.msra.mxu1 %v1394_v39  ;;  %8067 = vmatprep.mubr.f32.mxu1 %v1432_v63  ;;  %v1436_v15 = vand.u32 4294901760, %v1435_v13 }
 0x50a   : > { %8065 = vmatprep.subr.mxu1 %v9175_v36 }
 0x50b   : > { %8066 = vmatpush3.msra.mxu1 %v9175_v36  ;;  %8032 = vmatprep.mubr.f32.mxu0 %v1436_v15 }
 0x50c   : > { %8077 = vmatprep.subr.mxu1 %v2003_v18  ;;  %8033 = vmatmul.mubr.f32.vlgmr.msra.gmra.mxu0 %v1446_v19 }
 0x50d   : > { %8043 = vmatpush3.msra.mxu0 %v9180_v41  ;;  %8068 = vmatmul.mubr.f32.vlgmr.msra.gmra.mxu1 %v9205_v59 }
 0x50e   : > { %8078 = vmatpush3.xpose.msra.mxu1 %v2003_v18  ;;  %8044 = vmatprep.subr.mxu0 %v9178_v38 }
 0x50f   : > { %8046 = vmatprep.mubr.f32.mxu0 %v1433_v4  ;;  %8079 = vmatprep.subr.mxu1 %v2010_v21 }
 0x510   : > { %8081 = vmatprep.mubr.f32.mxu1 %v9220_v9  ;;  %8045 = vmatpush3.msra.mxu0 %v9178_v38 }
 0x511   : > { %8056 = vmatprep.subr.mxu0 %v9188_v44  ;;  %8047 = vmatmul.mubr.f32.vlgmr.msra.gmra.mxu0 %v1443_v0 }
 0x512   : > { %8057 = vmatpush3.msra.mxu0 %v9188_v44  ;;  %8080 = vmatpush3.xpose.msra.mxu1 %v2010_v21 }
 0x513   : > { %8058 = vmatprep.subr.mxu0 %v9183_v42  ;;  %8060 = vmatprep.mubr.f32.mxu0 %v1432_v63 }
 0x514   : > { %8091 = vmatprep.subr.mxu1 %v9191_v46  ;;  %8059 = vmatpush3.msra.mxu0 %v9183_v42 }
 0x515   : > { %8070 = vmatprep.subr.mxu0 %v9191_v46  ;;  %8082 = vmatmul.mubr.f32.vlgmr.msra.gmra.mxu1 %v1960_v20 }
 0x516   : > { %8061 = vmatmul.mubr.f32.vlgmr.msra.gmra.mxu0 %v9205_v59  ;;  %8092 = vmatpush3.xpose.msra.mxu1 %v9191_v46 }
 0x517   : > { %8071 = vmatpush3.xpose.msra.mxu0 %v9191_v46  ;;  %8095 = vmatprep.mubr.f32.mxu1 %v1952_v22 }
 0x518   : > { %8072 = vmatprep.subr.mxu0 %v9199_v54  ;;  %8074 = vmatprep.mubr.f32.mxu0 %v1954_v26 }
 0x519   : > { %8093 = vmatprep.subr.mxu1 %v9199_v54 }
 0x51a   : > { %8094 = vmatpush3.xpose.msra.mxu1 %v9199_v54 }
 0x51b   : > { %8073 = vmatpush3.xpose.msra.mxu0 %v9199_v54  ;;  %8105 = vmatprep.subr.mxu1 %v9191_v46 }
 0x51c   : > { %8084 = vmatprep.subr.mxu0 %v9202_v55 }
 0x51d   : > { %8096 = vmatmul.mubr.f32.vlgmr.msra.gmra.mxu1 %v1962_v25 }
 0x51e   : > { %8075 = vmatmul.mubr.f32.vlgmr.msra.gmra.mxu0 %v1964_v28  ;;  %8106 = vmatpush3.xpose.msra.mxu1 %v9191_v46 }
 0x51f   : > { %8085 = vmatpush3.xpose.msra.mxu0 %v9202_v55  ;;  %8088 = vmatprep.mubr.f32.mxu0 %v1951_v17 }
 0x520   : > { %8109 = vmatprep.mubr.f32.mxu1 %v9220_v9  ;;  %8086 = vmatprep.subr.mxu0 %v9209_v62 }
 0x521   : > { %8107 = vmatprep.subr.mxu1 %v9199_v54 }
 0x522   : > { %8108 = vmatpush3.xpose.msra.mxu1 %v9199_v54 }
 0x523   : > { %8087 = vmatpush3.xpose.msra.mxu0 %v9209_v62 }
 0x524   : > { %8098 = vmatprep.subr.mxu0 %v9213_v1 }
 0x525   : > { %8110 = vmatmul.mubr.f32.vlgmr.msra.gmra.mxu1 %v1960_v20 }
 0x526   : > { %8089 = vmatmul.mubr.f32.vlgmr.msra.gmra.mxu0 %v1961_v23 }
 0x527   : > { %8099 = vmatpush3.xpose.msra.mxu0 %v9213_v1  ;;  %8102 = vmatprep.mubr.f32.mxu0 %v9220_v9 }
 0x528   : > { %8100 = vmatprep.subr.mxu0 %v9218_v8 }
 0x52b   : > { %8101 = vmatpush3.xpose.msra.mxu0 %v9218_v8 }
 0x52e   : > { %8103 = vmatmul.mubr.f32.vlgmr.msra.gmra.mxu0 %v1960_v20 }
 0x5c4   : > { %v8041_v30 = vpop.f32.mrf.mxu1 }
 0x5c6   : > { %v1529_v31 = vpop.f32.mrf.mxu1 }
 0x5c8   : > { %v8055_v35 = vpop.f32.mrf.mxu1 }
 0x5ca   : > { %v1693_v39 = vpop.f32.mrf.mxu1 }
 0x5cc   : > { %v8034_v33 = vpop.f32.mrf.mxu0 }
 0x5cd   : > { %v1536_v34 = vadd.f32 %v8041_v30, %v8034_v33  ;;  %v8069_v44 = vpop.f32.mrf.mxu1 }
 0x5ce   : > { %v1438_v36 = vpop.f32.mrf.mxu0 }
 0x5cf   : > { %v1530_v37 = vadd.f32 %v1529_v31, %v1438_v36  ;;  %v1857_v51 = vpop.f32.mrf.mxu1 }
 0x5d1   : > { %v8048_v38 = vpop.f32.mrf.mxu0 }
 0x5d2   : > { %v1619_v40 = vadd.f32 %v8048_v38, %v1536_v34 }
 0x5d3   : > { %v1611_v41 = vpop.f32.mrf.mxu0 }
 0x5d4   : > { %v1612_v42 = vadd.f32 %v1611_v41, %v1530_v37  ;;  %v1702_v43 = vadd.f32 %v8055_v35, %v1619_v40 }
 0x5d5   : > { %v8083_v54 = vpop.f32.mrf.mxu1 }
 0x5d6   : > { %v8062_v45 = vpop.f32.mrf.mxu0  ;;  %v1694_v46 = vadd.f32 %v1693_v39, %v1612_v42 }
 0x5d7   : > { %v1785_v47 = vadd.f32 %v8062_v45, %v1702_v43  ;;  %v2047_v56 = vpop.f32.mrf.mxu1 }
 0x5d8   : > { %v1778_v48 = vpop.f32.mrf.mxu0 }
 0x5d9   : > { %v9264_v49 = vadd.f32 %v8069_v44, %v1785_v47  ;;  %v1779_v50 = vadd.f32 %v1778_v48, %v1694_v46 }
 0x5db   : > { %v9266_v52 = vadd.f32 %v1857_v51, %v1779_v50 }
 0x5dd   : > { %v8097_v59 = vpop.f32.mrf.mxu1 }
 0x5de   : > { %v8076_v53 = vpop.f32.mrf.mxu0 }
 0x5df   : > { %v2054_v58 = vadd.f32 %v8083_v54, %v8076_v53  ;;  %v2211_v0 = vpop.f32.mrf.mxu1 }
 0x5e0   : > { %v1956_v55 = vpop.f32.mrf.mxu0 }
 0x5e1   : > { %v2048_v61 = vadd.f32 %v2047_v56, %v1956_v55 }
 0x5e5   : > { %v8111_v2 = vpop.f32.mrf.mxu1 }
 0x5e6   : > { %v8090_v57 = vpop.f32.mrf.mxu0 }
 0x5e7   : > { %v2137_v62 = vadd.f32 %v8090_v57, %v2054_v58  ;;  %v2375_v11 = vpop.f32.mrf.mxu1 }
 0x5e8   : > { %v2129_v60 = vpop.f32.mrf.mxu0 }
 0x5e9   : > { %v2130_v63 = vadd.f32 %v2129_v60, %v2048_v61  ;;  %v2220_v1 = vadd.f32 %v8097_v59, %v2137_v62 }
 0x5eb   : > { %v2212_v7 = vadd.f32 %v2211_v0, %v2130_v63 }
 0x5ee   : > { %v8104_v4 = vpop.f32.mrf.mxu0 }
 0x5ef   : > { %v2303_v6 = vadd.f32 %v8104_v4, %v2220_v1 }
 0x5f0   : > { %v2296_v8 = vpop.f32.mrf.mxu0 }
 0x5f1   : > { %v2297_v9 = vadd.f32 %v2296_v8, %v2212_v7  ;;  %v2382_v10 = vadd.f32 %v8111_v2, %v2303_v6 }
 0x5f3   : > { %v2388_v12 = vsel %vm1330_vm2, %v2382_v10, -inf  ;;  %v2376_v13 = vadd.f32 %v2375_v11, %v2297_v9 }
 0x5f4   : > { %2389 = vmax.xlane.f32.xlu1 %v2388_v12 }
 0x5f5   : > { %v2385_v14 = vsel %vm1330_vm2, %v2376_v13, -inf }
 0x5f6   : > { %2386 = vmax.xlane.f32.xlu0 %v2385_v14 }
 0x605   : > { %2407 = vrot.lane.b32.xlu1 %v9155_v32, %s8892_s27 }
 0x609   : > { %2927 = vrot.lane.b32.xlu1 %v9153_v29, %s8893_s22 }
 0x60d   : > { %2925 = vrot.lane.b32.xlu1 %v9155_v32, %s8893_s22 }
 0x611   : > { %2923 = vrot.lane.b32.xlu1 %v9153_v29, %s8894_s24 }
 0x67d   : > { %v2390_v15 = vpop.xlane.xlu1 %2389 }
 0x67e   : > { %v2392_v16 = vsub.f32 %v2382_v10, %v2390_v15 }
 0x67f   : > { %v2387_v17 = vpop.xlane.xlu0 %2386 }
 0x680   : > { %v2395_v18 = vmul.f32 1.442695, %v2392_v16  ;;  %v2391_v19 = vsub.f32 %v2376_v13, %v2387_v17 }
 0x681   : > { %v2408_v25 = vpop.permute.xlu1 %2407 }
 0x682   : > { %8723 = vpow2.f32 %v2395_v18  ;;  %v2393_v20 = vmul.f32 1.442695, %v2391_v19  ;;  %v9278_v27 = vand.u32 4294901760, %v2408_v25 }
 0x684   : > { %8725 = vpow2.f32 %v2393_v20  ;;  %v9281_v31 = vsub.f32 %v2408_v25, %v9278_v27 }
 0x685   : > { %v2928_v30 = vpop.permute.xlu1 %2927 }
 0x686   : > { %v2935_v35 = vsel %vm819_vm1, %v2928_v30, 0  ;;  %v9287_v37 = vand.u32 4294901760, %v9281_v31 }
 0x687   : > { %v9293_v41 = vand.u32 4294901760, %v2935_v35 }
 0x688   : > { %v2545_v44 = vsub.f32 %v9281_v31, %v9287_v37 }
 0x689   : > { %v2926_v38 = vpop.permute.xlu1 %2925  ;;  %v9308_v53 = vsub.f32 %v2935_v35, %v9293_v41 }
 0x68a   : > { %v2933_v42 = vsel %vm819_vm1, %v2926_v38, 0  ;;  %v2546_v54 = vand.u32 4294901760, %v2545_v44 }
 0x68b   : > { %v9303_v50 = vand.u32 4294901760, %v2933_v42  ;;  %v9316_v62 = vand.u32 4294901760, %v9308_v53 }
 0x68d   : > { %v9313_v59 = vsub.f32 %v2933_v42, %v9303_v50  ;;  %v2924_v4 = vpop.permute.xlu1 %2923  ;;  %v3056_v7 = vsub.f32 %v9308_v53, %v9316_v62 }
 0x68e   : > { %v2931_v10 = vsel %vm819_vm1, %v2924_v4, 0 }
 0x68f   : > { %v8724_v21 = vpop.eup %8723  ;;  %v9321_v2 = vand.u32 4294901760, %v9313_v59  ;;  %v3057_v14 = vand.u32 4294901760, %v3056_v7  ;;  %v3014_v16 = vand.u32 4294901760, %v2931_v10 }
 0x690   : > { %v2400_v22 = vsel %vm1330_vm2, %v8724_v21, 0.0 }
 0x691   : > { %v8726_v23 = vpop.eup %8725  ;;  %2401 = vadd.xlane.f32.xlu0 %v2400_v22  ;;  %v3063_v12 = vsub.f32 %v9313_v59, %v9321_v2  ;;  %v3015_v19 = vsub.f32 %v2931_v10, %v3014_v16 }
 0x692   : > { %v2397_v24 = vsel %vm1330_vm2, %v8726_v23, 0.0 }
 0x693   : > { %v3064_v17 = vand.u32 4294901760, %v3063_v12 }
 0x695   : > { %2398 = vadd.xlane.f32.xlu0 %v2397_v24 }
 0x6ab   : > { %2409 = vrot.lane.b32.xlu0 %v9153_v29, %s8892_s27 }
 0x6af   : > { %2921 = vrot.lane.b32.xlu0 %v9155_v32, %s8894_s24 }
 0x71a   : > { %v2402_v26 = vpop.xlane.xlu0 %2401 }
 0x71b   : > { %8727 = vrcp.f32 %v2402_v26 }
 0x71e   : > { %v2399_v28 = vpop.xlane.xlu0 %2398 }
 0x71f   : > { %8729 = vrcp.f32 %v2399_v28 }
 0x722   : > { %v2410_v33 = vpop.permute.xlu0 %2409 }
 0x723   : > { %v2448_v34 = vand.u32 4294901760, %v2410_v33 }
 0x725   : > { %v9284_v36 = vsub.f32 %v2410_v33, %v2448_v34  ;;  %8112 = vmatprep.subr.mxu0 %v2448_v34 }
 0x726   : > { %8113 = vmatpush3.msra.mxu0 %v2448_v34  ;;  %v2922_v57 = vpop.permute.xlu0 %2921 }
 0x727   : > { %8114 = vmatprep.subr.mxu0 %v9278_v27  ;;  %v9291_v39 = vand.u32 4294901760, %v9284_v36  ;;  %v2929_v63 = vsel %vm819_vm1, %v2922_v57, 0 }
 0x728   : > { %v8728_v40 = vpop.eup %8727  ;;  %8115 = vmatpush3.msra.mxu0 %v9278_v27  ;;  %v9323_v6 = vand.u32 4294901760, %v2929_v63 }
 0x729   : > { %8126 = vmatprep.subr.mxu0 %v9284_v36  ;;  %v2538_v43 = vsub.f32 %v9284_v36, %v9291_v39  ;;  %v2406_v45 = vmul.f32 %v8728_v40, %v8724_v21  ;;  %v3016_v21 = vand.u32 4294901760, %v3015_v19 }
 0x72a   : > { %v3005_v13 = vsub.f32 %v2929_v63, %v9323_v6 }
 0x72b   : > { %v2539_v46 = vand.u32 4294901760, %v2538_v43  ;;  %v2417_v47 = vsel %vm1330_vm2, %v2406_v45, 0 }
 0x72c   : > { %v8730_v48 = vpop.eup %8729  ;;  %v9305_v51 = vand.u32 4294901760, %v2417_v47  ;;  %v3006_v18 = vand.u32 4294901760, %v3005_v13 }
 0x72d   : > { %8119 = vmatprep.subr.mxu1 %v2539_v46  ;;  %v2404_v55 = vmul.f32 %v8730_v48, %v8726_v23  ;;  %v3017_v23 = vsub.f32 %v3015_v19, %v3016_v21 }
 0x72e   : > { %8120 = vmatpush3.msra.mxu1 %v2539_v46  ;;  %v2497_v56 = vsub.f32 %v2417_v47, %v9305_v51  ;;  %v3007_v20 = vsub.f32 %v3005_v13, %v3006_v18 }
 0x72f   : > { %8121 = vmatprep.subr.mxu1 %v2546_v54  ;;  %v2414_v58 = vsel %vm1330_vm2, %v2404_v55, 0  ;;  %v3018_v24 = vand.u32 4294901760, %v3017_v23 }
 0x730   : > { %8122 = vmatpush3.msra.mxu1 %v2546_v54  ;;  %v2486_v60 = vand.u32 4294901760, %v2414_v58  ;;  %v2498_v61 = vand.u32 4294901760, %v2497_v56  ;;  %v3008_v22 = vand.u32 4294901760, %v3007_v20 }
 0x731   : > { %8133 = vmatprep.subr.mxu1 %v2448_v34 }
 0x732   : > { %8123 = vmatprep.mubr.f32.mxu1 %v2486_v60  ;;  %v2487_v0 = vsub.f32 %v2414_v58, %v2486_v60  ;;  %v2499_v8 = vsub.f32 %v2497_v56, %v2498_v61 }
 0x733   : > { %8124 = vmatmul.mubr.f32.vlgmr.msra.gmra.mxu1 %v9305_v51 }
 0x734   : > { %8134 = vmatpush3.msra.mxu1 %v2448_v34  ;;  %v2488_v1 = vand.u32 4294901760, %v2487_v0  ;;  %v2500_v15 = vand.u32 4294901760, %v2499_v8 }
 0x735   : > { %8135 = vmatprep.subr.mxu1 %v9278_v27 }
 0x736   : > { %8136 = vmatpush3.msra.mxu1 %v9278_v27  ;;  %8137 = vmatprep.mubr.f32.mxu1 %v2488_v1  ;;  %v2489_v9 = vsub.f32 %v2487_v0, %v2488_v1 }
 0x737   : > { %8147 = vmatprep.subr.mxu1 %v2448_v34  ;;  %8138 = vmatmul.mubr.f32.vlgmr.msra.gmra.mxu1 %v2498_v61 }
 0x738   : > { %8148 = vmatpush3.msra.mxu1 %v2448_v34  ;;  %8151 = vmatprep.mubr.f32.mxu1 %v2486_v60  ;;  %v2490_v11 = vand.u32 4294901760, %v2489_v9 }
 0x739   : > { %8149 = vmatprep.subr.mxu1 %v9278_v27 }
 0x73a   : > { %8150 = vmatpush3.msra.mxu1 %v9278_v27  ;;  %8116 = vmatprep.mubr.f32.mxu0 %v2490_v11 }
 0x73b   : > { %8161 = vmatprep.subr.mxu1 %v3057_v14  ;;  %8117 = vmatmul.mubr.f32.vlgmr.msra.gmra.mxu0 %v2500_v15 }
 0x73c   : > { %8127 = vmatpush3.msra.mxu0 %v9284_v36  ;;  %8152 = vmatmul.mubr.f32.vlgmr.msra.gmra.mxu1 %v9305_v51 }
 0x73d   : > { %8162 = vmatpush3.xpose.msra.mxu1 %v3057_v14  ;;  %8128 = vmatprep.subr.mxu0 %v9281_v31 }
 0x73e   : > { %8130 = vmatprep.mubr.f32.mxu0 %v2487_v0  ;;  %8163 = vmatprep.subr.mxu1 %v3064_v17 }
 0x73f   : > { %8165 = vmatprep.mubr.f32.mxu1 %v9323_v6  ;;  %8129 = vmatpush3.msra.mxu0 %v9281_v31 }
 0x740   : > { %8140 = vmatprep.subr.mxu0 %v9291_v39  ;;  %8131 = vmatmul.mubr.f32.vlgmr.msra.gmra.mxu0 %v2497_v56 }
 0x741   : > { %8141 = vmatpush3.msra.mxu0 %v9291_v39  ;;  %8164 = vmatpush3.xpose.msra.mxu1 %v3064_v17 }
 0x742   : > { %8142 = vmatprep.subr.mxu0 %v9287_v37  ;;  %8144 = vmatprep.mubr.f32.mxu0 %v2486_v60 }
 0x743   : > { %8175 = vmatprep.subr.mxu1 %v9293_v41  ;;  %8143 = vmatpush3.msra.mxu0 %v9287_v37 }
 0x744   : > { %8154 = vmatprep.subr.mxu0 %v9293_v41  ;;  %8166 = vmatmul.mubr.f32.vlgmr.msra.gmra.mxu1 %v3014_v16 }
 0x745   : > { %8145 = vmatmul.mubr.f32.vlgmr.msra.gmra.mxu0 %v9305_v51  ;;  %8176 = vmatpush3.xpose.msra.mxu1 %v9293_v41 }
 0x746   : > { %8155 = vmatpush3.xpose.msra.mxu0 %v9293_v41  ;;  %8179 = vmatprep.mubr.f32.mxu1 %v3006_v18 }
 0x747   : > { %8156 = vmatprep.subr.mxu0 %v9303_v50  ;;  %8158 = vmatprep.mubr.f32.mxu0 %v3008_v22 }
 0x748   : > { %8177 = vmatprep.subr.mxu1 %v9303_v50 }
 0x749   : > { %8178 = vmatpush3.xpose.msra.mxu1 %v9303_v50 }
 0x74a   : > { %8157 = vmatpush3.xpose.msra.mxu0 %v9303_v50  ;;  %8189 = vmatprep.subr.mxu1 %v9293_v41 }
 0x74b   : > { %8168 = vmatprep.subr.mxu0 %v9308_v53 }
 0x74c   : > { %8180 = vmatmul.mubr.f32.vlgmr.msra.gmra.mxu1 %v3016_v21 }
 0x74d   : > { %8159 = vmatmul.mubr.f32.vlgmr.msra.gmra.mxu0 %v3018_v24  ;;  %8190 = vmatpush3.xpose.msra.mxu1 %v9293_v41 }
 0x74e   : > { %8169 = vmatpush3.xpose.msra.mxu0 %v9308_v53  ;;  %8172 = vmatprep.mubr.f32.mxu0 %v3005_v13 }
 0x74f   : > { %8193 = vmatprep.mubr.f32.mxu1 %v9323_v6  ;;  %8170 = vmatprep.subr.mxu0 %v9313_v59 }
 0x750   : > { %8191 = vmatprep.subr.mxu1 %v9303_v50 }
 0x751   : > { %8192 = vmatpush3.xpose.msra.mxu1 %v9303_v50 }
 0x752   : > { %8171 = vmatpush3.xpose.msra.mxu0 %v9313_v59 }
 0x753   : > { %8182 = vmatprep.subr.mxu0 %v9316_v62 }
 0x754   : > { %8194 = vmatmul.mubr.f32.vlgmr.msra.gmra.mxu1 %v3014_v16 }
 0x755   : > { %8173 = vmatmul.mubr.f32.vlgmr.msra.gmra.mxu0 %v3015_v19 }
 0x756   : > { %8183 = vmatpush3.xpose.msra.mxu0 %v9316_v62  ;;  %8186 = vmatprep.mubr.f32.mxu0 %v9323_v6 }
 0x757   : > { %8184 = vmatprep.subr.mxu0 %v9321_v2 }
 0x75a   : > { %8185 = vmatpush3.xpose.msra.mxu0 %v9321_v2 }
 0x75d   : > { %8187 = vmatmul.mubr.f32.vlgmr.msra.gmra.mxu0 %v3014_v16 }
 0x7f3   : > { %v8125_v25 = vpop.f32.mrf.mxu1 }
 0x7f5   : > { %v2583_v26 = vpop.f32.mrf.mxu1 }
 0x7f7   : > { %v8139_v30 = vpop.f32.mrf.mxu1 }
 0x7f9   : > { %v2747_v35 = vpop.f32.mrf.mxu1 }
 0x7fb   : > { %v8118_v27 = vpop.f32.mrf.mxu0 }
 0x7fc   : > { %v2590_v28 = vadd.f32 %v8125_v25, %v8118_v27  ;;  %v8153_v40 = vpop.f32.mrf.mxu1 }
 0x7fd   : > { %v2492_v31 = vpop.f32.mrf.mxu0 }
 0x7fe   : > { %v2584_v33 = vadd.f32 %v2583_v26, %v2492_v31  ;;  %v2911_v47 = vpop.f32.mrf.mxu1 }
 0x800   : > { %v8132_v34 = vpop.f32.mrf.mxu0 }
 0x801   : > { %v2673_v36 = vadd.f32 %v8132_v34, %v2590_v28 }
 0x802   : > { %v2665_v37 = vpop.f32.mrf.mxu0 }
 0x803   : > { %v2666_v38 = vadd.f32 %v2665_v37, %v2584_v33  ;;  %v2756_v39 = vadd.f32 %v8139_v30, %v2673_v36 }
 0x804   : > { %v8167_v51 = vpop.f32.mrf.mxu1 }
 0x805   : > { %v8146_v41 = vpop.f32.mrf.mxu0  ;;  %v2748_v42 = vadd.f32 %v2747_v35, %v2666_v38 }
 0x806   : > { %v2839_v43 = vadd.f32 %v8146_v41, %v2756_v39  ;;  %v3101_v54 = vpop.f32.mrf.mxu1 }
 0x807   : > { %v2832_v44 = vpop.f32.mrf.mxu0 }
 0x808   : > { %v9367_v45 = vadd.f32 %v8153_v40, %v2839_v43  ;;  %v2833_v46 = vadd.f32 %v2832_v44, %v2748_v42 }
 0x80a   : > { %v9369_v48 = vadd.f32 %v2911_v47, %v2833_v46 }
 0x80c   : > { %v8181_v57 = vpop.f32.mrf.mxu1 }
 0x80d   : > { %v8160_v50 = vpop.f32.mrf.mxu0 }
 0x80e   : > { %v3108_v56 = vadd.f32 %v8167_v51, %v8160_v50  ;;  %v3265_v62 = vpop.f32.mrf.mxu1 }
 0x80f   : > { %v3010_v53 = vpop.f32.mrf.mxu0 }
 0x810   : > { %v3102_v59 = vadd.f32 %v3101_v54, %v3010_v53 }
 0x814   : > { %v8195_v0 = vpop.f32.mrf.mxu1 }
 0x815   : > { %v8174_v55 = vpop.f32.mrf.mxu0 }
 0x816   : > { %v3191_v60 = vadd.f32 %v8174_v55, %v3108_v56  ;;  %v3429_v9 = vpop.f32.mrf.mxu1 }
 0x817   : > { %v3183_v58 = vpop.f32.mrf.mxu0 }
 0x818   : > { %v3184_v61 = vadd.f32 %v3183_v58, %v3102_v59  ;;  %v3274_v63 = vadd.f32 %v8181_v57, %v3191_v60 }
 0x81a   : > { %v3266_v4 = vadd.f32 %v3265_v62, %v3184_v61 }
 0x81d   : > { %v8188_v1 = vpop.f32.mrf.mxu0 }
 0x81e   : > { %v3357_v2 = vadd.f32 %v8188_v1, %v3274_v63 }
 0x81f   : > { %v3350_v6 = vpop.f32.mrf.mxu0 }
 0x820   : > { %v3351_v7 = vadd.f32 %v3350_v6, %v3266_v4  ;;  %v3436_v8 = vadd.f32 %v8195_v0, %v3357_v2 }
 0x822   : > { %v3442_v10 = vsel %vm1330_vm2, %v3436_v8, -inf  ;;  %v3430_v11 = vadd.f32 %v3429_v9, %v3351_v7 }
 0x823   : > { %3443 = vmax.xlane.f32.xlu1 %v3442_v10 }
 0x824   : > { %v3439_v12 = vsel %vm1330_vm2, %v3430_v11, -inf }
 0x825   : > { %3440 = vmax.xlane.f32.xlu0 %v3439_v12 }
 0x834   : > { %3461 = vrot.lane.b32.xlu1 %v9155_v32, %s8895_s25 }
 0x838   : > { %3981 = vrot.lane.b32.xlu1 %v9153_v29, %s8896_s28 }
 0x83c   : > { %3979 = vrot.lane.b32.xlu1 %v9155_v32, %s8896_s28 }
 0x840   : > { %3977 = vrot.lane.b32.xlu1 %v9153_v29, %s8897_s4 }
 0x8ac   : > { %v3444_v13 = vpop.xlane.xlu1 %3443 }
 0x8ad   : > { %v3446_v14 = vsub.f32 %v3436_v8, %v3444_v13 }
 0x8ae   : > { %v3441_v15 = vpop.xlane.xlu0 %3440 }
 0x8af   : > { %v3449_v16 = vmul.f32 1.442695, %v3446_v14  ;;  %v3445_v17 = vsub.f32 %v3430_v11, %v3441_v15 }
 0x8b0   : > { %v3462_v23 = vpop.permute.xlu1 %3461 }
 0x8b1   : > { %8731 = vpow2.f32 %v3449_v16  ;;  %v3447_v18 = vmul.f32 1.442695, %v3445_v17  ;;  %v9381_v25 = vand.u32 4294901760, %v3462_v23 }
 0x8b3   : > { %8733 = vpow2.f32 %v3447_v18  ;;  %v9384_v28 = vsub.f32 %v3462_v23, %v9381_v25 }
 0x8b4   : > { %v3982_v27 = vpop.permute.xlu1 %3981 }
 0x8b5   : > { %v3989_v33 = vsel %vm819_vm1, %v3982_v27, 0  ;;  %v9390_v35 = vand.u32 4294901760, %v9384_v28 }
 0x8b6   : > { %v9396_v39 = vand.u32 4294901760, %v3989_v33 }
 0x8b7   : > { %v3599_v42 = vsub.f32 %v9384_v28, %v9390_v35 }
 0x8b8   : > { %v3980_v36 = vpop.permute.xlu1 %3979  ;;  %v9411_v53 = vsub.f32 %v3989_v33, %v9396_v39 }
 0x8b9   : > { %v3987_v40 = vsel %vm819_vm1, %v3980_v36, 0  ;;  %v3600_v54 = vand.u32 4294901760, %v3599_v42 }
 0x8ba   : > { %v9406_v50 = vand.u32 4294901760, %v3987_v40  ;;  %v9419_v62 = vand.u32 4294901760, %v9411_v53 }
 0x8bc   : > { %v9416_v59 = vsub.f32 %v3987_v40, %v9406_v50  ;;  %v3978_v4 = vpop.permute.xlu1 %3977  ;;  %v4110_v7 = vsub.f32 %v9411_v53, %v9419_v62 }
 0x8bd   : > { %v3985_v10 = vsel %vm819_vm1, %v3978_v4, 0 }
 0x8be   : > { %v8732_v19 = vpop.eup %8731  ;;  %v9424_v2 = vand.u32 4294901760, %v9416_v59  ;;  %v4111_v14 = vand.u32 4294901760, %v4110_v7  ;;  %v4068_v16 = vand.u32 4294901760, %v3985_v10 }
 0x8bf   : > { %v3454_v20 = vsel %vm1330_vm2, %v8732_v19, 0.0 }
 0x8c0   : > { %v8734_v21 = vpop.eup %8733  ;;  %3455 = vadd.xlane.f32.xlu0 %v3454_v20  ;;  %v4117_v12 = vsub.f32 %v9416_v59, %v9424_v2 }
 0x8c1   : > { %v3451_v22 = vsel %vm1330_vm2, %v8734_v21, 0.0 }
 0x8c2   : > { %v4118_v17 = vand.u32 4294901760, %v4117_v12  ;;  %v8759_v12 = vld [vmem:[#allocation6 + $0x18] sm:$0xff] }
 0x8c4   : > { %3452 = vadd.xlane.f32.xlu0 %v3451_v22 }
 0x8da   : > { %3463 = vrot.lane.b32.xlu0 %v9153_v29, %s8895_s25 }
 0x8de   : > { %3975 = vrot.lane.b32.xlu0 %v9155_v32, %s8897_s4 }
 0x949   : > { %v3456_v24 = vpop.xlane.xlu0 %3455 }
 0x94a   : > { %8735 = vrcp.f32 %v3456_v24 }
 0x94d   : > { %v3453_v26 = vpop.xlane.xlu0 %3452 }
 0x94e   : > { %8737 = vrcp.f32 %v3453_v26 }
 0x951   : > { %v3464_v30 = vpop.permute.xlu0 %3463 }
 0x952   : > { %v3502_v31 = vand.u32 4294901760, %v3464_v30 }
 0x954   : > { %v9387_v34 = vsub.f32 %v3464_v30, %v3502_v31  ;;  %8196 = vmatprep.subr.mxu0 %v3502_v31 }
 0x955   : > { %8197 = vmatpush3.msra.mxu0 %v3502_v31  ;;  %v3976_v57 = vpop.permute.xlu0 %3975 }
 0x956   : > { %8198 = vmatprep.subr.mxu0 %v9381_v25  ;;  %v9394_v37 = vand.u32 4294901760, %v9387_v34  ;;  %v3983_v63 = vsel %vm819_vm1, %v3976_v57, 0 }
 0x957   : > { %v8736_v38 = vpop.eup %8735  ;;  %8199 = vmatpush3.msra.mxu0 %v9381_v25  ;;  %v9426_v6 = vand.u32 4294901760, %v3983_v63 }
 0x958   : > { %8210 = vmatprep.subr.mxu0 %v9387_v34  ;;  %v3592_v41 = vsub.f32 %v9387_v34, %v9394_v37  ;;  %v3460_v43 = vmul.f32 %v8736_v38, %v8732_v19  ;;  %v4069_v19 = vsub.f32 %v3985_v10, %v4068_v16 }
 0x959   : > { %v4059_v13 = vsub.f32 %v3983_v63, %v9426_v6 }
 0x95a   : > { %v3593_v44 = vand.u32 4294901760, %v3592_v41  ;;  %v3471_v46 = vsel %vm1330_vm2, %v3460_v43, 0 }
 0x95b   : > { %v8738_v47 = vpop.eup %8737  ;;  %v9408_v51 = vand.u32 4294901760, %v3471_v46  ;;  %v4060_v18 = vand.u32 4294901760, %v4059_v13 }
 0x95c   : > { %8203 = vmatprep.subr.mxu1 %v3593_v44  ;;  %v3458_v55 = vmul.f32 %v8738_v47, %v8734_v21  ;;  %v4070_v21 = vand.u32 4294901760, %v4069_v19 }
 0x95d   : > { %8204 = vmatpush3.msra.mxu1 %v3593_v44  ;;  %v3551_v56 = vsub.f32 %v3471_v46, %v9408_v51  ;;  %v4061_v20 = vsub.f32 %v4059_v13, %v4060_v18 }
 0x95e   : > { %8205 = vmatprep.subr.mxu1 %v3600_v54  ;;  %v3468_v58 = vsel %vm1330_vm2, %v3458_v55, 0  ;;  %v4071_v23 = vsub.f32 %v4069_v19, %v4070_v21 }
 0x95f   : > { %8206 = vmatpush3.msra.mxu1 %v3600_v54  ;;  %v3540_v60 = vand.u32 4294901760, %v3468_v58  ;;  %v3552_v61 = vand.u32 4294901760, %v3551_v56  ;;  %v4062_v22 = vand.u32 4294901760, %v4061_v20 }
 0x960   : > { %8217 = vmatprep.subr.mxu1 %v3502_v31  ;;  %v4072_v24 = vand.u32 4294901760, %v4071_v23 }
 0x961   : > { %8207 = vmatprep.mubr.f32.mxu1 %v3540_v60  ;;  %v3541_v0 = vsub.f32 %v3468_v58, %v3540_v60  ;;  %v3553_v8 = vsub.f32 %v3551_v56, %v3552_v61 }
 0x962   : > { %8208 = vmatmul.mubr.f32.vlgmr.msra.gmra.mxu1 %v9408_v51 }
 0x963   : > { %8218 = vmatpush3.msra.mxu1 %v3502_v31  ;;  %v3542_v1 = vand.u32 4294901760, %v3541_v0  ;;  %v3554_v15 = vand.u32 4294901760, %v3553_v8 }
 0x964   : > { %8219 = vmatprep.subr.mxu1 %v9381_v25 }
 0x965   : > { %8220 = vmatpush3.msra.mxu1 %v9381_v25  ;;  %8221 = vmatprep.mubr.f32.mxu1 %v3542_v1  ;;  %v3543_v9 = vsub.f32 %v3541_v0, %v3542_v1 }
 0x966   : > { %8231 = vmatprep.subr.mxu1 %v3502_v31  ;;  %8222 = vmatmul.mubr.f32.vlgmr.msra.gmra.mxu1 %v3552_v61 }
 0x967   : > { %8232 = vmatpush3.msra.mxu1 %v3502_v31  ;;  %8235 = vmatprep.mubr.f32.mxu1 %v3540_v60  ;;  %v3544_v11 = vand.u32 4294901760, %v3543_v9 }
 0x968   : > { %8233 = vmatprep.subr.mxu1 %v9381_v25 }
 0x969   : > { %8234 = vmatpush3.msra.mxu1 %v9381_v25  ;;  %8200 = vmatprep.mubr.f32.mxu0 %v3544_v11 }
 0x96a   : > { %8245 = vmatprep.subr.mxu1 %v4111_v14  ;;  %8201 = vmatmul.mubr.f32.vlgmr.msra.gmra.mxu0 %v3554_v15 }
 0x96b   : > { %8211 = vmatpush3.msra.mxu0 %v9387_v34  ;;  %8236 = vmatmul.mubr.f32.vlgmr.msra.gmra.mxu1 %v9408_v51 }
 0x96c   : > { %8246 = vmatpush3.xpose.msra.mxu1 %v4111_v14  ;;  %8212 = vmatprep.subr.mxu0 %v9384_v28 }
 0x96d   : > { %8214 = vmatprep.mubr.f32.mxu0 %v3541_v0  ;;  %8247 = vmatprep.subr.mxu1 %v4118_v17 }
 0x96e   : > { %8249 = vmatprep.mubr.f32.mxu1 %v9426_v6  ;;  %8213 = vmatpush3.msra.mxu0 %v9384_v28 }
 0x96f   : > { %8224 = vmatprep.subr.mxu0 %v9394_v37  ;;  %8215 = vmatmul.mubr.f32.vlgmr.msra.gmra.mxu0 %v3551_v56 }
 0x970   : > { %8225 = vmatpush3.msra.mxu0 %v9394_v37  ;;  %8248 = vmatpush3.xpose.msra.mxu1 %v4118_v17  ;;  %v8761_v17 = vld [vmem:[#allocation6] sm:$0xff] }
 0x971   : > { %8226 = vmatprep.subr.mxu0 %v9390_v35  ;;  %8228 = vmatprep.mubr.f32.mxu0 %v3540_v60 }
 0x972   : > { %8259 = vmatprep.subr.mxu1 %v9396_v39  ;;  %8227 = vmatpush3.msra.mxu0 %v9390_v35 }
 0x973   : > { %8238 = vmatprep.subr.mxu0 %v9396_v39  ;;  %8250 = vmatmul.mubr.f32.vlgmr.msra.gmra.mxu1 %v4068_v16 }
 0x974   : > { %8229 = vmatmul.mubr.f32.vlgmr.msra.gmra.mxu0 %v9408_v51  ;;  %8260 = vmatpush3.xpose.msra.mxu1 %v9396_v39 }
 0x975   : > { %8239 = vmatpush3.xpose.msra.mxu0 %v9396_v39  ;;  %8263 = vmatprep.mubr.f32.mxu1 %v4060_v18 }
 0x976   : > { %8240 = vmatprep.subr.mxu0 %v9406_v50  ;;  %8242 = vmatprep.mubr.f32.mxu0 %v4062_v22 }
 0x977   : > { %8261 = vmatprep.subr.mxu1 %v9406_v50 }
 0x978   : > { %8262 = vmatpush3.xpose.msra.mxu1 %v9406_v50 }
 0x979   : > { %8241 = vmatpush3.xpose.msra.mxu0 %v9406_v50  ;;  %8273 = vmatprep.subr.mxu1 %v9396_v39 }
 0x97a   : > { %8252 = vmatprep.subr.mxu0 %v9411_v53 }
 0x97b   : > { %8264 = vmatmul.mubr.f32.vlgmr.msra.gmra.mxu1 %v4070_v21 }
 0x97c   : > { %8243 = vmatmul.mubr.f32.vlgmr.msra.gmra.mxu0 %v4072_v24  ;;  %8274 = vmatpush3.xpose.msra.mxu1 %v9396_v39 }
 0x97d   : > { %8253 = vmatpush3.xpose.msra.mxu0 %v9411_v53  ;;  %8256 = vmatprep.mubr.f32.mxu0 %v4059_v13 }
 0x97e   : > { %8277 = vmatprep.mubr.f32.mxu1 %v9426_v6  ;;  %8254 = vmatprep.subr.mxu0 %v9416_v59 }
 0x97f   : > { %8275 = vmatprep.subr.mxu1 %v9406_v50 }
 0x980   : > { %8276 = vmatpush3.xpose.msra.mxu1 %v9406_v50 }
 0x981   : > { %8255 = vmatpush3.xpose.msra.mxu0 %v9416_v59 }
 0x982   : > { %8266 = vmatprep.subr.mxu0 %v9419_v62 }
 0x983   : > { %8278 = vmatmul.mubr.f32.vlgmr.msra.gmra.mxu1 %v4068_v16 }
 0x984   : > { %8257 = vmatmul.mubr.f32.vlgmr.msra.gmra.mxu0 %v4069_v19 }
 0x985   : > { %8267 = vmatpush3.xpose.msra.mxu0 %v9419_v62  ;;  %8270 = vmatprep.mubr.f32.mxu0 %v9426_v6 }
 0x986   : > { %8268 = vmatprep.subr.mxu0 %v9424_v2 }
 0x989   : > { %8269 = vmatpush3.xpose.msra.mxu0 %v9424_v2 }
 0x98c   : > { %8271 = vmatmul.mubr.f32.vlgmr.msra.gmra.mxu0 %v4068_v16  ;;  %v8760_v16 = vld [vmem:[#allocation6 + $0x8] sm:$0xff] }
 0xa22   : > { %v8209_v25 = vpop.f32.mrf.mxu1 }
 0xa24   : > { %v3637_v26 = vpop.f32.mrf.mxu1 }
 0xa26   : > { %v8223_v28 = vpop.f32.mrf.mxu1 }
 0xa28   : > { %v3801_v34 = vpop.f32.mrf.mxu1 }
 0xa2a   : > { %v8202_v27 = vpop.f32.mrf.mxu0 }
 0xa2b   : > { %v8237_v37 = vpop.f32.mrf.mxu1  ;;  %v3644_v10 = vadd.f32 %v8209_v25, %v8202_v27 }
 0xa2c   : > { %v3546_v30 = vpop.f32.mrf.mxu0 }
 0xa2d   : > { %v3638_v31 = vadd.f32 %v3637_v26, %v3546_v30  ;;  %v3965_v42 = vpop.f32.mrf.mxu1 }
 0xa2f   : > { %v8216_v33 = vpop.f32.mrf.mxu0 }
 0xa30   : > { %v3727_v11 = vadd.f32 %v8216_v33, %v3644_v10  ;;  %v8762_v33 = vld [vmem:[#allocation6 + $0x10] sm:$0xff] }
 0xa31   : > { %v3719_v35 = vpop.f32.mrf.mxu0 }
 0xa32   : > { %v3720_v36 = vadd.f32 %v3719_v35, %v3638_v31  ;;  %v3810_v13 = vadd.f32 %v8223_v28, %v3727_v11 }
 0xa33   : > { %v8251_v46 = vpop.f32.mrf.mxu1 }
 0xa34   : > { %v8230_v38 = vpop.f32.mrf.mxu0  ;;  %v3802_v39 = vadd.f32 %v3801_v34, %v3720_v36 }
 0xa35   : > { %v4155_v50 = vpop.f32.mrf.mxu1  ;;  %v3893_v14 = vadd.f32 %v8230_v38, %v3810_v13 }
 0xa36   : > { %v3886_v40 = vpop.f32.mrf.mxu0 }
 0xa37   : > { %v3887_v41 = vadd.f32 %v3886_v40, %v3802_v39  ;;  %v3972_v15 = vadd.f32 %v8237_v37, %v3893_v14 }
 0xa39   : > { %v9470_v43 = vadd.f32 %v3965_v42, %v3887_v41 }
 0xa3b   : > { %v8265_v54 = vpop.f32.mrf.mxu1 }
 0xa3c   : > { %v8244_v44 = vpop.f32.mrf.mxu0 }
 0xa3d   : > { %v4162_v53 = vadd.f32 %v8251_v46, %v8244_v44  ;;  %v4319_v59 = vpop.f32.mrf.mxu1 }
 0xa3e   : > { %v4064_v47 = vpop.f32.mrf.mxu0 }
 0xa3f   : > { %v4156_v56 = vadd.f32 %v4155_v50, %v4064_v47 }
 0xa43   : > { %v8279_v61 = vpop.f32.mrf.mxu1 }
 0xa44   : > { %v8258_v51 = vpop.f32.mrf.mxu0 }
 0xa45   : > { %v4245_v57 = vadd.f32 %v8258_v51, %v4162_v53  ;;  %v4483_v6 = vpop.f32.mrf.mxu1 }
 0xa46   : > { %v4237_v55 = vpop.f32.mrf.mxu0 }
 0xa47   : > { %v4238_v58 = vadd.f32 %v4237_v55, %v4156_v56  ;;  %v4328_v60 = vadd.f32 %v8265_v54, %v4245_v57 }
 0xa49   : > { %v4320_v0 = vadd.f32 %v4319_v59, %v4238_v58 }
 0xa4c   : > { %v8272_v62 = vpop.f32.mrf.mxu0 }
 0xa4d   : > { %v4411_v63 = vadd.f32 %v8272_v62, %v4328_v60 }
 0xa4e   : > { %v4404_v1 = vpop.f32.mrf.mxu0 }
 0xa4f   : > { %v4405_v2 = vadd.f32 %v4404_v1, %v4320_v0  ;;  %v4490_v4 = vadd.f32 %v8279_v61, %v4411_v63 }
 0xa51   : > { %v4496_v7 = vsel %vm1330_vm2, %v4490_v4, -inf  ;;  %v4484_v8 = vadd.f32 %v4483_v6, %v4405_v2 }
 0xa52   : > { %4497 = vmax.xlane.f32.xlu1 %v4496_v7 }
 0xa53   : > { %v4493_v9 = vsel %vm1330_vm2, %v4484_v8, -inf }
 0xa54   : > { %4494 = vmax.xlane.f32.xlu0 %v4493_v9 }
 0xa63   : > { %4515 = vrot.lane.b32.xlu1 %v9155_v32, %s8898_s5 }
 0xa67   : > { %5070 = vrot.lane.b32.xlu1 %v8759_v12, %s8899_s7 }
 0xa6b   : > { %5031 = vrot.lane.b32.xlu1 %v9369_v48, %s8900_s8 }
 0xa6f   : > { %5033 = vrot.lane.b32.xlu1 %v9367_v45, %s8900_s8 }
 0xa73   : > { %5041 = vrot.lane.b32.xlu1 %v3972_v15, %s8901_s9 }
 0xa77   : > { %5066 = vrot.lane.b32.xlu1 %v8760_v16, %s8899_s7 }
 0xa7b   : > { %5064 = vrot.lane.b32.xlu1 %v8761_v17, %s8899_s7 }
 0xadb   : > { %v4498_v32 = vpop.xlane.xlu1 %4497 }
 0xadc   : > { %v4500_v18 = vsub.f32 %v4490_v4, %v4498_v32 }
 0xadd   : > { %v4495_v19 = vpop.xlane.xlu0 %4494 }
 0xade   : > { %v4503_v20 = vmul.f32 1.442695, %v4500_v18  ;;  %v4499_v21 = vsub.f32 %v4484_v8, %v4495_v19 }
 0xadf   : > { %v4516_v22 = vpop.permute.xlu1 %4515 }
 0xae0   : > { %8739 = vpow2.f32 %v4503_v20  ;;  %v4501_v48 = vmul.f32 1.442695, %v4499_v21 }
 0xae2   : > { %8741 = vpow2.f32 %v4501_v48 }
 0xae3   : > { %v9481_v23 = vpop.permute.xlu1 %5070 }
 0xae4   : > { %v9500_v0 = vand.u32 4294901760, %v9481_v23 }
 0xae6   : > { %v9510_v4 = vsub.f32 %v9481_v23, %v9500_v0 }
 0xae7   : > { %v5032_v45 = vpop.permute.xlu1 %5031 }
 0xae8   : > { %v9485_v24 = vsel %vm819_vm1, %v9266_v52, %v5032_v45  ;;  %v9518_v9 = vand.u32 4294901760, %v9510_v4 }
 0xaea   : > { %v5199_v12 = vsub.f32 %v9510_v4, %v9518_v9 }
 0xaeb   : > { %v5034_v25 = vpop.permute.xlu1 %5033 }
 0xaec   : > { %v9489_v26 = vsel %vm819_vm1, %v9264_v49, %v5034_v25  ;;  %v4559_v49 = vand.u32 4294901760, %v4516_v22  ;;  %v5200_v16 = vand.u32 4294901760, %v5199_v12 }
 0xaed   : > { %v8740_v27 = vpop.eup %8739 }
 0xaee   : > { %v4508_v28 = vsel %vm1330_vm2, %v8740_v27, 0.0  ;;  %v4651_v35 = vsub.f32 %v4516_v22, %v4559_v49 }
 0xaef   : > { %v8742_v30 = vpop.eup %8741  ;;  %4509 = vadd.xlane.f32.xlu0 %v4508_v28  ;;  %v9512_v6 = vpop.permute.xlu1 %5041 }
 0xaf0   : > { %v4505_v31 = vsel %vm1330_vm2, %v8742_v30, 0.0  ;;  %v4652_v39 = vand.u32 4294901760, %v4651_v35 }
 0xaf2   : > { %v4653_v42 = vsub.f32 %v4651_v35, %v4652_v39 }
 0xaf3   : > { %4506 = vadd.xlane.f32.xlu0 %v4505_v31  ;;  %v5067_v8 = vpop.permute.xlu1 %5066 }
 0xaf4   : > { %v4654_v51 = vand.u32 4294901760, %v4653_v42  ;;  %v9523_v11 = vand.u32 4294901760, %v5067_v8 }
 0xaf6   : > { %v9530_v14 = vsub.f32 %v5067_v8, %v9523_v11 }
 0xaf7   : > { %v5065_v15 = vpop.permute.xlu1 %5064 }
 0xaf8   : > { %v9534_v32 = vand.u32 4294901760, %v5065_v15  ;;  %v9537_v18 = vand.u32 4294901760, %v9530_v14 }
 0xafa   : > { %v9540_v19 = vsub.f32 %v5065_v15, %v9534_v32  ;;  %v5213_v20 = vsub.f32 %v9530_v14, %v9537_v18 }
 0xafc   : > { %v5214_v21 = vand.u32 4294901760, %v5213_v20  ;;  %v9547_v22 = vand.u32 4294901760, %v9540_v19 }
 0xafe   : > { %v5220_v48 = vsub.f32 %v9540_v19, %v9547_v22 }
 0xb00   : > { %v5221_v23 = vand.u32 4294901760, %v5220_v48 }
 0xb09   : > { %4517 = vrot.lane.b32.xlu0 %v9153_v29, %s8898_s5 }
 0xb0d   : > { %5068 = vrot.lane.b32.xlu0 %v8762_v33, %s8899_s7 }
 0xb11   : > { %5039 = vrot.lane.b32.xlu0 %v9470_v43, %s8901_s9 }
 0xb78   : > { %v4510_v52 = vpop.xlane.xlu0 %4509 }
 0xb79   : > { %8743 = vrcp.f32 %v4510_v52 }
 0xb7c   : > { %v4507_v34 = vpop.xlane.xlu0 %4506 }
 0xb7d   : > { %8745 = vrcp.f32 %v4507_v34 }
 0xb80   : > { %v4518_v36 = vpop.permute.xlu0 %4517 }
 0xb81   : > { %v4556_v37 = vand.u32 4294901760, %v4518_v36 }
 0xb83   : > { %v4644_v38 = vsub.f32 %v4518_v36, %v4556_v37  ;;  %8280 = vmatprep.subr.mxu0 %v4556_v37 }
 0xb84   : > { %8281 = vmatpush3.msra.mxu0 %v4556_v37  ;;  %v5069_v1 = vpop.permute.xlu0 %5068 }
 0xb85   : > { %8282 = vmatprep.subr.mxu0 %v4559_v49  ;;  %v4645_v40 = vand.u32 4294901760, %v4644_v38  ;;  %v9502_v2 = vand.u32 4294901760, %v5069_v1 }
 0xb86   : > { %v8744_v29 = vpop.eup %8743  ;;  %8283 = vmatpush3.msra.mxu0 %v4559_v49 }
 0xb87   : > { %8294 = vmatprep.subr.mxu0 %v4644_v38  ;;  %v4646_v41 = vsub.f32 %v4644_v38, %v4645_v40  ;;  %v4514_v43 = vmul.f32 %v8744_v29, %v8740_v27  ;;  %v9515_v7 = vsub.f32 %v5069_v1, %v9502_v2 }
 0xb89   : > { %v4647_v44 = vand.u32 4294901760, %v4646_v41  ;;  %v4525_v46 = vsel %vm1330_vm2, %v4514_v43, 0  ;;  %v9521_v10 = vand.u32 4294901760, %v9515_v7 }
 0xb8a   : > { %v8746_v47 = vpop.eup %8745  ;;  %v4604_v50 = vand.u32 4294901760, %v4525_v46 }
 0xb8b   : > { %8287 = vmatprep.subr.mxu1 %v4647_v44  ;;  %v4512_v53 = vmul.f32 %v8746_v47, %v8742_v30  ;;  %v5206_v13 = vsub.f32 %v9515_v7, %v9521_v10  ;;  %v5040_v47 = vpop.permute.xlu0 %5039 }
 0xb8c   : > { %8288 = vmatpush3.msra.mxu1 %v4647_v44  ;;  %v4605_v54 = vsub.f32 %v4525_v46, %v4604_v50 }
 0xb8d   : > { %8289 = vmatprep.subr.mxu1 %v4654_v51  ;;  %v4522_v55 = vsel %vm1330_vm2, %v4512_v53, 0  ;;  %v5207_v17 = vand.u32 4294901760, %v5206_v13 }
 0xb8e   : > { %8290 = vmatpush3.msra.mxu1 %v4654_v51  ;;  %v4594_v56 = vand.u32 4294901760, %v4522_v55  ;;  %v4606_v57 = vand.u32 4294901760, %v4605_v54 }
 0xb8f   : > { %8301 = vmatprep.subr.mxu1 %v4556_v37 }
 0xb90   : > { %8291 = vmatprep.mubr.f32.mxu1 %v4594_v56  ;;  %v4595_v58 = vsub.f32 %v4522_v55, %v4594_v56  ;;  %v4607_v60 = vsub.f32 %v4605_v54, %v4606_v57 }
 0xb91   : > { %8292 = vmatmul.mubr.f32.vlgmr.msra.gmra.mxu1 %v4604_v50 }
 0xb92   : > { %8302 = vmatpush3.msra.mxu1 %v4556_v37  ;;  %v4596_v59 = vand.u32 4294901760, %v4595_v58  ;;  %v4608_v63 = vand.u32 4294901760, %v4607_v60 }
 0xb93   : > { %8303 = vmatprep.subr.mxu1 %v4559_v49 }
 0xb94   : > { %8304 = vmatpush3.msra.mxu1 %v4559_v49  ;;  %8305 = vmatprep.mubr.f32.mxu1 %v4596_v59  ;;  %v4597_v61 = vsub.f32 %v4595_v58, %v4596_v59 }
 0xb95   : > { %8315 = vmatprep.subr.mxu1 %v4556_v37  ;;  %8306 = vmatmul.mubr.f32.vlgmr.msra.gmra.mxu1 %v4606_v57 }
 0xb96   : > { %8316 = vmatpush3.msra.mxu1 %v4556_v37  ;;  %8319 = vmatprep.mubr.f32.mxu1 %v4594_v56  ;;  %v4598_v62 = vand.u32 4294901760, %v4597_v61 }
 0xb97   : > { %8317 = vmatprep.subr.mxu1 %v4559_v49 }
 0xb98   : > { %8318 = vmatpush3.msra.mxu1 %v4559_v49  ;;  %8284 = vmatprep.mubr.f32.mxu0 %v4598_v62 }
 0xb99   : > { %8285 = vmatmul.mubr.f32.vlgmr.msra.gmra.mxu0 %v4608_v63  ;;  %8320 = vmatmul.mubr.f32.vlgmr.msra.gmra.mxu1 %v4604_v50 }
 0xb9a   : > { %8295 = vmatpush3.msra.mxu0 %v4644_v38  ;;  %8298 = vmatprep.mubr.f32.mxu0 %v4595_v58 }
 0xb9b   : > { %8296 = vmatprep.subr.mxu0 %v4651_v35  ;;  %8333 = vmatprep.subr.mxu1 %v5200_v16 }
 0xb9c   : > { %8297 = vmatpush3.msra.mxu0 %v4651_v35  ;;  %8334 = vmatpush3.msra.mxu1 %v5200_v16 }
 0xb9d   : > { %8308 = vmatprep.subr.mxu0 %v4645_v40  ;;  %8299 = vmatmul.mubr.f32.vlgmr.msra.gmra.mxu0 %v4605_v54 }
 0xb9e   : > { %8309 = vmatpush3.msra.mxu0 %v4645_v40  ;;  %8312 = vmatprep.mubr.f32.mxu0 %v4594_v56  ;;  %v5056_v56 = vsel %vm1330_vm2, %v9489_v26, %v9512_v6 }
 0xb9f   : > { %8310 = vmatprep.subr.mxu0 %v4652_v39  ;;  %8335 = vmatprep.subr.mxu1 %v5207_v17 }
 0xba0   : > { %8311 = vmatpush3.msra.mxu0 %v4652_v39  ;;  %8336 = vmatpush3.msra.mxu1 %v5207_v17 }
 0xba1   : > { %8313 = vmatmul.mubr.f32.vlgmr.msra.gmra.mxu0 %v4604_v50  ;;  %8322 = vmatprep.subr.mxu0 %v9500_v0  ;;  %v5055_v50 = vsel %vm1330_vm2, %v9485_v24, %v5040_v47 }
 0xba2   : > { %8323 = vmatpush3.msra.mxu0 %v9500_v0  ;;  %8337 = vmatprep.subr.mxu1 %v5214_v21 }
 0xba3   : > { %8324 = vmatprep.subr.mxu0 %v9502_v2  ;;  %8338 = vmatpush3.msra.mxu1 %v5214_v21 }
 0xba4   : > { %8325 = vmatpush3.msra.mxu0 %v9502_v2  ;;  %8339 = vmatprep.subr.mxu1 %v5221_v23 }
 0xba5   : > { %8326 = vmatprep.subr.mxu0 %v9523_v11  ;;  %8340 = vmatpush3.msra.mxu1 %v5221_v23 }
 0xba6   : > { %8327 = vmatpush3.msra.mxu0 %v9523_v11  ;;  %8355 = vmatprep.subr.mxu1 %v9500_v0 }
 0xba7   : > { %8328 = vmatprep.subr.mxu0 %v9534_v32 }
 0xba8   : > { %8329 = vmatpush3.msra.mxu0 %v9534_v32 }
 0xba9   : > { %8344 = vmatprep.subr.mxu0 %v9510_v4 }
 0xc51   : > { %v8293_v45 = vpop.f32.mrf.mxu1 }
 0xc53   : > { %v4691_v25 = vpop.f32.mrf.mxu1 }
 0xc55   : > { %v8307_v27 = vpop.f32.mrf.mxu1 }
 0xc57   : > { %v4855_v33 = vpop.f32.mrf.mxu1 }
 0xc59   : > { %v8286_v28 = vpop.f32.mrf.mxu0  ;;  %v8321_v37 = vpop.f32.mrf.mxu1 }
 0xc5a   : > { %v4698_v31 = vadd.f32 %v8293_v45, %v8286_v28  ;;  %v7513_v45 = vld [vmem:[#allocation4 + $0x7] ss:$0 sm:$0xff] }
 0xc5b   : > { %v4600_v30 = vpop.f32.mrf.mxu0  ;;  %v5019_v42 = vpop.f32.mrf.mxu1 }
 0xc5c   : > { %v4692_v49 = vadd.f32 %v4691_v25, %v4600_v30 }
 0xc5d   : > { %v8300_v52 = vpop.f32.mrf.mxu0 }
 0xc5e   : > { %v4781_v34 = vadd.f32 %v8300_v52, %v4698_v31 }
 0xc5f   : > { %v4773_v35 = vpop.f32.mrf.mxu0 }
 0xc60   : > { %v4774_v36 = vadd.f32 %v4773_v35, %v4692_v49  ;;  %v4864_v39 = vadd.f32 %v8307_v27, %v4781_v34 }
 0xc61   : > { %v8314_v38 = vpop.f32.mrf.mxu0 }
 0xc62   : > { %v4856_v40 = vadd.f32 %v4855_v33, %v4774_v36  ;;  %v4947_v43 = vadd.f32 %v8314_v38, %v4864_v39 }
 0xc63   : > { %v4940_v29 = vpop.f32.mrf.mxu0 }
 0xc64   : > { %v4941_v41 = vadd.f32 %v4940_v29, %v4856_v40  ;;  %v5026_v46 = vadd.f32 %v8321_v37, %v4947_v43  ;;  %v5662_v29 = vld [vmem:[#allocation6 + $0x38] sm:$0xff] }
 0xc65   : > { %v9608_v43 = vand.u32 4294901760, %v5662_v29 }
 0xc66   : > { %v5020_v44 = vadd.f32 %v5019_v42, %v4941_v41  ;;  %v5661_v41 = vld [vmem:[#allocation6 + $0x30] sm:$0xff]  ;;  %v5660_v42 = vld [vmem:[#allocation6 + $0x28] sm:$0xff] }
 0xc67   : > { %v9615_v47 = vsub.f32 %v5662_v29, %v9608_v43 }
 0xc68   : > { %5047 = vrot.lane.b32.xlu0 %v5020_v44, %s8902_s11  ;;  %v9610_v44 = vand.u32 4294901760, %v5661_v41 }
 0xc6c   : > { %5049 = vrot.lane.b32.xlu0 %v5026_v46, %s8902_s11  ;;  %v9612_v46 = vand.u32 4294901760, %v5660_v42 }
 0xcda   : > { %v5048_v51 = vpop.permute.xlu0 %5047 }
 0xcdb   : > { %v5058_v53 = vsel %vm5057_vm3, %v5055_v50, %v5048_v51  ;;  %v9618_v50 = vsub.f32 %v5661_v41, %v9610_v44  ;;  %v9621_v51 = vsub.f32 %v5660_v42, %v9612_v46  ;;  %v6222_v42 = vld [vmem:[#allocation6 + $0x50] sm:$0xff] }
 0xcdc   : > { %v5077_v54 = vsel %vm230_vm0, %v5058_v53, 0  ;;  %v9626_v53 = vand.u32 4294901760, %v9615_v47 }
 0xcdd   : > { %v5151_v55 = vand.u32 4294901760, %v5077_v54 }
 0xcde   : > { %v5050_v57 = vpop.permute.xlu0 %5049 }
 0xcdf   : > { %v5152_v58 = vsub.f32 %v5077_v54, %v5151_v55  ;;  %v5059_v59 = vsel %vm5057_vm3, %v5056_v56, %v5050_v57  ;;  %8341 = vmatprep.mubr.f32.mxu1 %v5151_v55  ;;  %v9629_v54 = vand.u32 4294901760, %v9618_v50  ;;  %v5791_v56 = vsub.f32 %v9615_v47, %v9626_v53 }
 0xce0   : > { %v5080_v60 = vsel %vm230_vm0, %v5059_v59, 0 }
 0xce1   : > { %v5161_v61 = vand.u32 4294901760, %v5080_v60  ;;  %v5153_v62 = vand.u32 4294901760, %v5152_v58  ;;  %v5798_v57 = vsub.f32 %v9618_v50, %v9629_v54  ;;  %v5792_v59 = vand.u32 4294901760, %v5791_v56 }
 0xce3   : > { %v5162_v63 = vsub.f32 %v5080_v60, %v5161_v61  ;;  %8342 = vmatmul.mubr.f32.vlgmr.msra.gmra.mxu1 %v5161_v61  ;;  %v5154_v24 = vsub.f32 %v5152_v58, %v5153_v62  ;;  %v5799_v60 = vand.u32 4294901760, %v5798_v57 }
 0xce4   : > { %8356 = vmatpush3.msra.mxu1 %v9500_v0  ;;  %8363 = vmatprep.mubr.f32.mxu1 %v5153_v62 }
 0xce5   : > { %8357 = vmatprep.subr.mxu1 %v9502_v2  ;;  %v5155_v1 = vand.u32 4294901760, %v5154_v24  ;;  %v5163_v8 = vand.u32 4294901760, %v5162_v63 }
 0xce6   : > { %8358 = vmatpush3.msra.mxu1 %v9502_v2 }
 0xce7   : > { %8359 = vmatprep.subr.mxu1 %v9523_v11  ;;  %8330 = vmatprep.mubr.f32.mxu0 %v5155_v1  ;;  %v5164_v26 = vsub.f32 %v5162_v63, %v5163_v8 }
 0xce8   : > { %8360 = vmatpush3.msra.mxu1 %v9523_v11 }
 0xce9   : > { %8361 = vmatprep.subr.mxu1 %v9534_v32  ;;  %v5165_v6 = vand.u32 4294901760, %v5164_v26 }
 0xcea   : > { %8362 = vmatpush3.msra.mxu1 %v9534_v32 }
 0xceb   : > { %8364 = vmatmul.mubr.f32.vlgmr.msra.gmra.mxu1 %v5163_v8  ;;  %8377 = vmatprep.subr.mxu1 %v9500_v0 }
 0xcec   : > { %8331 = vmatmul.mubr.f32.vlgmr.msra.gmra.mxu0 %v5165_v6  ;;  %8378 = vmatpush3.msra.mxu1 %v9500_v0 }
 0xced   : > { %8345 = vmatpush3.msra.mxu0 %v9510_v4  ;;  %8385 = vmatprep.mubr.f32.mxu1 %v5151_v55 }
 0xcee   : > { %8346 = vmatprep.subr.mxu0 %v9515_v7  ;;  %8352 = vmatprep.mubr.f32.mxu0 %v5152_v58 }
 0xcef   : > { %8379 = vmatprep.subr.mxu1 %v9502_v2  ;;  %8347 = vmatpush3.msra.mxu0 %v9515_v7 }
 0xcf0   : > { %8380 = vmatpush3.msra.mxu1 %v9502_v2  ;;  %8348 = vmatprep.subr.mxu0 %v9530_v14 }
 0xcf1   : > { %8381 = vmatprep.subr.mxu1 %v9523_v11  ;;  %8349 = vmatpush3.msra.mxu0 %v9530_v14 }
 0xcf2   : > { %8382 = vmatpush3.msra.mxu1 %v9523_v11  ;;  %8350 = vmatprep.subr.mxu0 %v9540_v19 }
 0xcf3   : > { %8383 = vmatprep.subr.mxu1 %v9534_v32  ;;  %8351 = vmatpush3.msra.mxu0 %v9540_v19 }
 0xcf4   : > { %8384 = vmatpush3.msra.mxu1 %v9534_v32  ;;  %8353 = vmatmul.mubr.f32.vlgmr.msra.gmra.mxu0 %v5162_v63 }
 0xcf5   : > { %8366 = vmatprep.subr.mxu0 %v9518_v9  ;;  %8386 = vmatmul.mubr.f32.vlgmr.msra.gmra.mxu1 %v5161_v61 }
 0xcf6   : > { %8367 = vmatpush3.msra.mxu0 %v9518_v9  ;;  %8374 = vmatprep.mubr.f32.mxu0 %v5151_v55  ;;  %v9632_v55 = vand.u32 4294901760, %v9621_v51 }
 0xcf7   : > { %8368 = vmatprep.subr.mxu0 %v9521_v10  ;;  %8399 = vmatprep.subr.mxu1 %v5792_v59 }
 0xcf8   : > { %8369 = vmatpush3.msra.mxu0 %v9521_v10  ;;  %v5805_v58 = vsub.f32 %v9621_v51, %v9632_v55  ;;  %8400 = vmatpush3.msra.mxu1 %v5792_v59 }
 0xcf9   : > { %8370 = vmatprep.subr.mxu0 %v9537_v18  ;;  %8401 = vmatprep.subr.mxu1 %v5799_v60 }
 0xcfa   : > { %8371 = vmatpush3.msra.mxu0 %v9537_v18  ;;  %v5806_v63 = vand.u32 4294901760, %v5805_v58  ;;  %8402 = vmatpush3.msra.mxu1 %v5799_v60 }
 0xcfb   : > { %8372 = vmatprep.subr.mxu0 %v9547_v22 }
 0xcfc   : > { %8373 = vmatpush3.msra.mxu0 %v9547_v22  ;;  %8403 = vmatprep.subr.mxu1 %v5806_v63 }
 0xcfd   : > { %8375 = vmatmul.mubr.f32.vlgmr.msra.gmra.mxu0 %v5161_v61  ;;  %8388 = vmatprep.subr.mxu0 %v9608_v43  ;;  %v5659_v61 = vld [vmem:[#allocation6 + $0x20] sm:$0xff] }
 0xcfe   : > { %8389 = vmatpush3.msra.mxu0 %v9608_v43  ;;  %v9644_v62 = vand.u32 4294901760, %v5659_v61  ;;  %8404 = vmatpush3.msra.mxu1 %v5806_v63 }
 0xcff   : > { %8390 = vmatprep.subr.mxu0 %v9610_v44 }
 0xd00   : > { %8391 = vmatpush3.msra.mxu0 %v9610_v44  ;;  %v9647_v24 = vsub.f32 %v5659_v61, %v9644_v62 }
 0xd01   : > { %8392 = vmatprep.subr.mxu0 %v9612_v46 }
 0xd02   : > { %8393 = vmatpush3.msra.mxu0 %v9612_v46  ;;  %v9652_v1 = vand.u32 4294901760, %v9647_v24 }
 0xd03   : > { %8394 = vmatprep.subr.mxu0 %v9644_v62 }
 0xd04   : > { %8395 = vmatpush3.msra.mxu0 %v9644_v62  ;;  %v5812_v8 = vsub.f32 %v9647_v24, %v9652_v1 }
 0xd05   : > { %8410 = vmatprep.subr.mxu0 %v9615_v47 }
 0xd06   : > { %v5813_v26 = vand.u32 4294901760, %v5812_v8 }
 0xd08   : > { %8405 = vmatprep.subr.mxu1 %v5813_v26 }
 0xd09   : > { %8406 = vmatpush3.msra.mxu1 %v5813_v26 }
 0xd0a   : > { %8421 = vmatprep.subr.mxu1 %v9608_v43 }
 0xda3   : > { %v8343_v2 = vpop.f32.mrf.mxu1 }
 0xda5   : > { %v5258_v11 = vpop.f32.mrf.mxu1 }
 0xdab   : > { %v8365_v12 = vpop.f32.mrf.mxu1 }
 0xdac   : > { %v8332_v0 = vpop.f32.mrf.mxu0 }
 0xdad   : > { %v5265_v9 = vadd.f32 %v8343_v2, %v8332_v0  ;;  %v5428_v16 = vpop.f32.mrf.mxu1 }
 0xdae   : > { %v5157_v4 = vpop.f32.mrf.mxu0 }
 0xdaf   : > { %v5259_v14 = vadd.f32 %v5258_v11, %v5157_v4 }
 0xdb4   : > { %v8354_v7 = vpop.f32.mrf.mxu0 }
 0xdb5   : > { %v5352_v15 = vadd.f32 %v8354_v7, %v5265_v9  ;;  %v8387_v32 = vpop.f32.mrf.mxu1 }
 0xdb6   : > { %v5344_v13 = vpop.f32.mrf.mxu0 }
 0xdb7   : > { %v5345_v10 = vadd.f32 %v5344_v13, %v5259_v14  ;;  %v5437_v17 = vadd.f32 %v8365_v12, %v5352_v15  ;;  %v5600_v23 = vpop.f32.mrf.mxu1  ;;  %v7514_v12 = vld [vmem:[#allocation4 + $0x2] ss:$0 sm:$0xff]  ;;  %v7515_v14 = vld [vmem:[#allocation4 + $0x3] ss:$0 sm:$0xff] }
 0xdb9   : > { %v5429_v20 = vadd.f32 %v5428_v16, %v5345_v10 }
 0xdbd   : > { %v8376_v18 = vpop.f32.mrf.mxu0 }
 0xdbe   : > { %v5526_v19 = vadd.f32 %v8376_v18, %v5437_v17 }
 0xdbf   : > { %v5519_v21 = vpop.f32.mrf.mxu0 }
 0xdc0   : > { %v5607_v22 = vadd.f32 %v8387_v32, %v5526_v19  ;;  %v5520_v48 = vadd.f32 %v5519_v21, %v5429_v20 }
 0xdc2   : > { %v5611_v25 = vadd.f32 %v5607_v22, %v9056_v5  ;;  %v5601_v27 = vadd.f32 %v5600_v23, %v5520_v48 }
 0xdc4   : > { %v5610_v28 = vadd.f32 %v5601_v27, %v9054_v3  ;;  %v9592_v30 = vadd.f32 %v7513_v45, %v5611_v25 }
 0xdc6   : > { %v5624_v31 = vsel %vm230_vm0, %v9592_v30, 0.0  ;;  %v9596_v33 = vadd.f32 %v7513_v45, %v5610_v28 }
 0xdc7   : > { %5625 = vadd.xlane.f32.xlu1 %v5624_v31 }
 0xdc8   : > { %v5621_v52 = vsel %vm230_vm0, %v9596_v33, 0.0 }
 0xdc9   : > { %5622 = vadd.xlane.f32.xlu0 %v5621_v52 }
 0xe50   : > { %v5626_v49 = vpop.xlane.xlu1 %5625 }
 0xe51   : > { %v5628_v34 = vmul.f32 0.03125, %v5626_v49  ;;  %v6227_v49 = vld [vmem:[#allocation6 + $0x78] sm:$0xff] }
 0xe52   : > { %v5623_v35 = vpop.xlane.xlu0 %5622 }
 0xe53   : > { %v5627_v36 = vmul.f32 0.03125, %v5623_v35  ;;  %v9601_v5 = vsub.f32 %v9592_v30, %v5628_v34  ;;  %v9691_v34 = vand.u32 4294901760, %v6227_v49  ;;  %v6226_v35 = vld [vmem:[#allocation6 + $0x70] sm:$0xff] }
 0xe55   : > { %v5629_v3 = vsub.f32 %v9596_v33, %v5627_v36  ;;  %v5632_v39 = vmul.f32 %v9601_v5, %v9601_v5  ;;  %v9694_v36 = vsub.f32 %v6227_v49, %v9691_v34 }
 0xe57   : > { %v5631_v37 = vmul.f32 %v5629_v3, %v5629_v3  ;;  %v5636_v40 = vsel %vm230_vm0, %v5632_v39, 0.0  ;;  %v9701_v39 = vand.u32 4294901760, %v9694_v36 }
 0xe59   : > { %v5633_v38 = vsel %vm230_vm0, %v5631_v37, 0.0  ;;  %v6224_v37 = vld [vmem:[#allocation6 + $0x60] sm:$0xff] }
 0xe5a   : > { %5634 = vadd.xlane.f32.xlu0 %v5633_v38  ;;  %v6223_v38 = vld [vmem:[#allocation6 + $0x58] sm:$0xff]  ;;  %v9708_v41 = vand.u32 4294901760, %v6224_v37 }
 0xe5c   : > { %v9729_v56 = vsub.f32 %v6224_v37, %v9708_v41 }
 0xe5e   : > { %5637 = vadd.xlane.f32.xlu0 %v5636_v40 }
 0xee3   : > { %v5635_v6 = vpop.xlane.xlu0 %5634 }
 0xee4   : > { %v5639_v0 = vmul.f32 0.03125, %v5635_v6 }
 0xee6   : > { %v5641_v2 = vadd.f32 1e-05, %v5639_v0 }
 0xee7   : > { %v5638_v4 = vpop.xlane.xlu0 %5637 }
 0xee8   : > { %8747 = vrsqrt.f32 %v5641_v2  ;;  %v5640_v7 = vmul.f32 0.03125, %v5638_v4 }
 0xeea   : > { %v5642_v11 = vadd.f32 1e-05, %v5640_v7 }
 0xeec   : > { %8749 = vrsqrt.f32 %v5642_v11 }
 0xef5   : > { %v8748_v9 = vpop.eup %8747 }
 0xef6   : > { %v5645_v13 = vmul.f32 %v8748_v9, %v5629_v3  ;;  %v6225_v3 = vld [vmem:[#allocation6 + $0x68] sm:$0xff] }
 0xef7   : > { %v9706_v29 = vand.u32 4294901760, %v6225_v3 }
 0xef8   : > { %v5651_v15 = vmul.f32 %v7514_v12, %v5645_v13 }
 0xef9   : > { %v8750_v10 = vpop.eup %8749 }
 0xefa   : > { %v5657_v16 = vadd.f32 %v7515_v14, %v5651_v15  ;;  %v5646_v17 = vmul.f32 %v8750_v10, %v9601_v5  ;;  %v9696_v5 = vand.u32 4294901760, %v6226_v35 }
 0xefc   : > { %v5669_v32 = vsel %vm230_vm0, %v5657_v16, 0  ;;  %v5652_v18 = vmul.f32 %v7514_v12, %v5646_v17  ;;  %v9704_v40 = vsub.f32 %v6226_v35, %v9696_v5 }
 0xefd   : > { %v5743_v19 = vand.u32 4294901760, %v5669_v32 }
 0xefe   : > { %v5658_v20 = vadd.f32 %v7515_v14, %v5652_v18  ;;  %v7516_v18 = vld [vmem:[#allocation4 + $0x8] ss:$0 sm:$0xff] }
 0xeff   : > { %8407 = vmatprep.mubr.f32.mxu1 %v5743_v19  ;;  %v5744_v21 = vsub.f32 %v5669_v32, %v5743_v19 }
 0xf00   : > { %v5672_v22 = vsel %vm230_vm0, %v5658_v20, 0 }
 0xf01   : > { %v5753_v48 = vand.u32 4294901760, %v5672_v22  ;;  %v5745_v23 = vand.u32 4294901760, %v5744_v21 }
 0xf03   : > { %v5754_v45 = vsub.f32 %v5672_v22, %v5753_v48  ;;  %8408 = vmatmul.mubr.f32.vlgmr.msra.gmra.mxu1 %v5753_v48  ;;  %v5746_v25 = vsub.f32 %v5744_v21, %v5745_v23 }
 0xf04   : > { %8422 = vmatpush3.msra.mxu1 %v9608_v43  ;;  %8429 = vmatprep.mubr.f32.mxu1 %v5745_v23 }
 0xf05   : > { %8423 = vmatprep.subr.mxu1 %v9610_v44  ;;  %v5747_v27 = vand.u32 4294901760, %v5746_v25  ;;  %v5755_v28 = vand.u32 4294901760, %v5754_v45 }
 0xf06   : > { %8424 = vmatpush3.msra.mxu1 %v9610_v44 }
 0xf07   : > { %8425 = vmatprep.subr.mxu1 %v9612_v46  ;;  %8396 = vmatprep.mubr.f32.mxu0 %v5747_v27  ;;  %v5756_v31 = vsub.f32 %v5754_v45, %v5755_v28 }
 0xf08   : > { %8426 = vmatpush3.msra.mxu1 %v9612_v46 }
 0xf09   : > { %8427 = vmatprep.subr.mxu1 %v9644_v62  ;;  %v5757_v52 = vand.u32 4294901760, %v5756_v31 }
 0xf0a   : > { %8428 = vmatpush3.msra.mxu1 %v9644_v62 }
 0xf0b   : > { %8430 = vmatmul.mubr.f32.vlgmr.msra.gmra.mxu1 %v5755_v28  ;;  %8443 = vmatprep.subr.mxu1 %v9608_v43 }
 0xf0c   : > { %8397 = vmatmul.mubr.f32.vlgmr.msra.gmra.mxu0 %v5757_v52  ;;  %8444 = vmatpush3.msra.mxu1 %v9608_v43  ;;  %v6221_v43 = vld [vmem:[#allocation6 + $0x48] sm:$0xff] }
 0xf0d   : > { %8411 = vmatpush3.msra.mxu0 %v9615_v47  ;;  %8451 = vmatprep.mubr.f32.mxu1 %v5743_v19  ;;  %v9713_v47 = vand.u32 4294901760, %v6222_v42 }
 0xf0e   : > { %8412 = vmatprep.subr.mxu0 %v9618_v50  ;;  %8418 = vmatprep.mubr.f32.mxu0 %v5744_v21 }
 0xf0f   : > { %8445 = vmatprep.subr.mxu1 %v9610_v44  ;;  %8413 = vmatpush3.msra.mxu0 %v9618_v50  ;;  %v9716_v50 = vand.u32 4294901760, %v6221_v43  ;;  %v9736_v58 = vsub.f32 %v6222_v42, %v9713_v47 }
 0xf10   : > { %8446 = vmatpush3.msra.mxu1 %v9610_v44  ;;  %8414 = vmatprep.subr.mxu0 %v9621_v51  ;;  %v6220_v44 = vld [vmem:[#allocation6 + $0x40] sm:$0xff] }
 0xf11   : > { %8447 = vmatprep.subr.mxu1 %v9612_v46  ;;  %8415 = vmatpush3.msra.mxu0 %v9621_v51  ;;  %v9718_v51 = vand.u32 4294901760, %v6220_v44  ;;  %v9739_v59 = vsub.f32 %v6221_v43, %v9716_v50  ;;  %v9758_v8 = vand.u32 4294901760, %v9736_v58 }
 0xf12   : > { %8448 = vmatpush3.msra.mxu1 %v9612_v46  ;;  %8416 = vmatprep.subr.mxu0 %v9647_v24  ;;  %v9711_v46 = vand.u32 4294901760, %v6223_v38 }
 0xf13   : > { %8449 = vmatprep.subr.mxu1 %v9644_v62  ;;  %8417 = vmatpush3.msra.mxu0 %v9647_v24  ;;  %v9743_v60 = vsub.f32 %v6220_v44, %v9718_v51  ;;  %v9751_v24 = vand.u32 4294901760, %v9729_v56  ;;  %v9766_v2 = vand.u32 4294901760, %v9739_v59  ;;  %v6383_v9 = vsub.f32 %v9736_v58, %v9758_v8 }
 0xf14   : > { %8450 = vmatpush3.msra.mxu1 %v9644_v62  ;;  %8419 = vmatmul.mubr.f32.vlgmr.msra.gmra.mxu0 %v5754_v45  ;;  %v9733_v57 = vsub.f32 %v6223_v38, %v9711_v46 }
 0xf15   : > { %8432 = vmatprep.subr.mxu0 %v9626_v53  ;;  %8452 = vmatmul.mubr.f32.vlgmr.msra.gmra.mxu1 %v5753_v48  ;;  %v6369_v0 = vsub.f32 %v9729_v56, %v9751_v24  ;;  %v9774_v12 = vand.u32 4294901760, %v9743_v60  ;;  %v6390_v14 = vsub.f32 %v9739_v59, %v9766_v2  ;;  %v6384_v15 = vand.u32 4294901760, %v6383_v9 }
 0xf16   : > { %8433 = vmatpush3.msra.mxu0 %v9626_v53  ;;  %8440 = vmatprep.mubr.f32.mxu0 %v5743_v19  ;;  %v6348_v53 = vsub.f32 %v9694_v36, %v9701_v39 }
 0xf17   : > { %8434 = vmatprep.subr.mxu0 %v9629_v54  ;;  %v6370_v11 = vand.u32 4294901760, %v6369_v0  ;;  %v6397_v10 = vsub.f32 %v9743_v60, %v9774_v12  ;;  %v6391_v16 = vand.u32 4294901760, %v6390_v14 }
 0xf18   : > { %8435 = vmatpush3.msra.mxu0 %v9629_v54  ;;  %v9723_v54 = vand.u32 4294901760, %v9704_v40  ;;  %v6349_v61 = vand.u32 4294901760, %v6348_v53 }
 0xf19   : > { %8436 = vmatprep.subr.mxu0 %v9632_v55  ;;  %v6398_v17 = vand.u32 4294901760, %v6397_v10 }
 0xf1a   : > { %8437 = vmatpush3.msra.mxu0 %v9632_v55  ;;  %v9726_v55 = vsub.f32 %v6225_v3, %v9706_v29  ;;  %v6355_v62 = vsub.f32 %v9704_v40, %v9723_v54  ;;  %8473 = vmatprep.subr.mxu1 %v6349_v61 }
 0xf1b   : > { %8438 = vmatprep.subr.mxu0 %v9652_v1  ;;  %8474 = vmatpush3.msra.mxu1 %v6349_v61 }
 0xf1c   : > { %8439 = vmatpush3.msra.mxu0 %v9652_v1  ;;  %v9748_v63 = vand.u32 4294901760, %v9726_v55  ;;  %v9755_v1 = vand.u32 4294901760, %v9733_v57  ;;  %v6356_v26 = vand.u32 4294901760, %v6355_v62 }
 0xf1d   : > { %8441 = vmatmul.mubr.f32.vlgmr.msra.gmra.mxu0 %v5753_v48  ;;  %8454 = vmatprep.subr.mxu0 %v9691_v34 }
 0xf1e   : > { %8455 = vmatpush3.msra.mxu0 %v9691_v34  ;;  %v6362_v6 = vsub.f32 %v9726_v55, %v9748_v63  ;;  %v6376_v4 = vsub.f32 %v9733_v57, %v9755_v1  ;;  %8475 = vmatprep.subr.mxu1 %v6356_v26 }
 0xf1f   : > { %8456 = vmatprep.subr.mxu0 %v9696_v5  ;;  %8476 = vmatpush3.msra.mxu1 %v6356_v26 }
 0xf20   : > { %8457 = vmatpush3.msra.mxu0 %v9696_v5  ;;  %v6363_v7 = vand.u32 4294901760, %v6362_v6  ;;  %v6377_v13 = vand.u32 4294901760, %v6376_v4 }
 0xf21   : > { %8458 = vmatprep.subr.mxu0 %v9706_v29 }
 0xf22   : > { %8459 = vmatpush3.msra.mxu0 %v9706_v29  ;;  %8477 = vmatprep.subr.mxu1 %v6363_v7 }
 0xf23   : > { %8460 = vmatprep.subr.mxu0 %v9708_v41  ;;  %8478 = vmatpush3.msra.mxu1 %v6363_v7 }
 0xf24   : > { %8461 = vmatpush3.msra.mxu0 %v9708_v41  ;;  %8479 = vmatprep.subr.mxu1 %v6370_v11 }
 0xf25   : > { %8462 = vmatprep.subr.mxu0 %v9711_v46  ;;  %8480 = vmatpush3.msra.mxu1 %v6370_v11 }
 0xf26   : > { %8463 = vmatpush3.msra.mxu0 %v9711_v46  ;;  %8481 = vmatprep.subr.mxu1 %v6377_v13 }
 0xf27   : > { %8464 = vmatprep.subr.mxu0 %v9713_v47  ;;  %8482 = vmatpush3.msra.mxu1 %v6377_v13 }
 0xf28   : > { %8465 = vmatpush3.msra.mxu0 %v9713_v47  ;;  %8483 = vmatprep.subr.mxu1 %v6384_v15 }
 0xf29   : > { %8466 = vmatprep.subr.mxu0 %v9716_v50  ;;  %8484 = vmatpush3.msra.mxu1 %v6384_v15 }
 0xf2a   : > { %8467 = vmatpush3.msra.mxu0 %v9716_v50  ;;  %8485 = vmatprep.subr.mxu1 %v6391_v16 }
 0xf2b   : > { %8468 = vmatprep.subr.mxu0 %v9718_v51  ;;  %8486 = vmatpush3.msra.mxu1 %v6391_v16 }
 0xf2c   : > { %8469 = vmatpush3.msra.mxu0 %v9718_v51  ;;  %8487 = vmatprep.subr.mxu1 %v6398_v17 }
 0xf2d   : > { %8492 = vmatprep.subr.mxu0 %v9694_v36  ;;  %8488 = vmatpush3.msra.mxu1 %v6398_v17 }
 0xf2e   : > { %8511 = vmatprep.subr.mxu1 %v9691_v34 }
 0xfc3   : > { %v8409_v19 = vpop.f32.mrf.mxu1 }
 0xfc5   : > { %v5850_v23 = vpop.f32.mrf.mxu1 }
 0xfcb   : > { %v8431_v25 = vpop.f32.mrf.mxu1 }
 0xfcc   : > { %v8398_v32 = vpop.f32.mrf.mxu0 }
 0xfcd   : > { %v5760_v21 = vadd.f32 %v8398_v32, %v7516_v18  ;;  %v6020_v49 = vpop.f32.mrf.mxu1 }
 0xfce   : > { %v5749_v20 = vpop.f32.mrf.mxu0 }
 0xfcf   : > { %v5750_v22 = vadd.f32 %v7516_v18, %v5749_v20  ;;  %v5857_v45 = vadd.f32 %v8409_v19, %v5760_v21 }
 0xfd1   : > { %v5851_v31 = vadd.f32 %v5850_v23, %v5750_v22 }
 0xfd4   : > { %v8420_v48 = vpop.f32.mrf.mxu0 }
 0xfd5   : > { %v5944_v28 = vadd.f32 %v8420_v48, %v5857_v45  ;;  %v8453_v3 = vpop.f32.mrf.mxu1 }
 0xfd6   : > { %v5936_v27 = vpop.f32.mrf.mxu0 }
 0xfd7   : > { %v5937_v52 = vadd.f32 %v5936_v27, %v5851_v31  ;;  %v6029_v35 = vadd.f32 %v8431_v25, %v5944_v28  ;;  %v6192_v61 = vpop.f32.mrf.mxu1 }
 0xfd9   : > { %v6021_v42 = vadd.f32 %v6020_v49, %v5937_v52 }
 0xfdd   : > { %v8442_v37 = vpop.f32.mrf.mxu0 }
 0xfde   : > { %v6118_v38 = vadd.f32 %v8442_v37, %v6029_v35 }
 0xfdf   : > { %v6111_v43 = vpop.f32.mrf.mxu0 }
 0xfe0   : > { %v6199_v44 = vadd.f32 %v8453_v3, %v6118_v38  ;;  %v6112_v53 = vadd.f32 %v6111_v43, %v6021_v42 }
 0xfe2   : > { %v6203_v62 = vmul.f32 %v6199_v44, %v6199_v44  ;;  %v6193_v26 = vadd.f32 %v6192_v61, %v6112_v53 }
 0xfe4   : > { %v6205_v6 = vmul.f32 %v6203_v62, %v6199_v44  ;;  %v6202_v0 = vmul.f32 %v6193_v26, %v6193_v26 }
 0xfe6   : > { %v6207_v4 = vmul.f32 0.044715, %v6205_v6  ;;  %v6204_v7 = vmul.f32 %v6202_v0, %v6193_v26 }
 0xfe8   : > { %v6209_v11 = vadd.f32 %v6207_v4, %v6199_v44  ;;  %v6206_v9 = vmul.f32 0.044715, %v6204_v7 }
 0xfea   : > { %v6211_v13 = vmul.f32 0.7978846, %v6209_v11  ;;  %v6208_v14 = vadd.f32 %v6206_v9, %v6193_v26  ;;  %v6867_v11 = vld [vmem:[#allocation6 + $0x98] sm:$0xff]  ;;  %v6866_v9 = vld [vmem:[#allocation6 + $0x90] sm:$0xff] }
 0xfec   : > { %8751 = vtanh.f32 %v6211_v13  ;;  %v6210_v15 = vmul.f32 0.7978846, %v6208_v14  ;;  %v6865_v13 = vld [vmem:[#allocation6 + $0x88] sm:$0xff]  ;;  %v9863_v14 = vand.u32 4294901760, %v6867_v11 }
 0xfee   : > { %8753 = vtanh.f32 %v6210_v15  ;;  %v9865_v15 = vand.u32 4294901760, %v6866_v9 }
 0xff9   : > { %v8752_v10 = vpop.eup %8751 }
 0xffa   : > { %v6215_v16 = vadd.f32 1.0, %v8752_v10  ;;  %v9867_v10 = vand.u32 4294901760, %v6865_v13 }
 0xffb   : > { %v8754_v17 = vpop.eup %8753 }
 0xffc   : > { %v6214_v32 = vadd.f32 1.0, %v8754_v17  ;;  %v6217_v18 = vmul.f32 0.5, %v6215_v16  ;;  %v6864_v16 = vld [vmem:[#allocation6 + $0x80] sm:$0xff] }
 0xffd   : > { %v9869_v17 = vand.u32 4294901760, %v6864_v16 }
 0xffe   : > { %v6216_v19 = vmul.f32 0.5, %v6214_v32  ;;  %v6219_v20 = vmul.f32 %v6217_v18, %v6199_v44  ;;  %v9872_v32 = vsub.f32 %v6867_v11, %v9863_v14  ;;  %v9875_v18 = vsub.f32 %v6866_v9, %v9865_v15 }
0x1000   : > { %v6218_v21 = vmul.f32 %v6216_v19, %v6193_v26  ;;  %v6233_v22 = vsel %vm6228_vm4, %v6219_v20, 0  ;;  %v9878_v19 = vsub.f32 %v6865_v13, %v9867_v10  ;;  %v9882_v20 = vsub.f32 %v6864_v16, %v9869_v17 }
0x1001   : > { %v9789_v48 = vand.u32 4294901760, %v6233_v22 }
0x1002   : > { %v6230_v23 = vsel %vm6228_vm4, %v6218_v21, 0  ;;  %v9886_v21 = vand.u32 4294901760, %v9872_v32 }
0x1003   : > { %v6308_v45 = vand.u32 4294901760, %v6230_v23  ;;  %v6319_v25 = vsub.f32 %v6233_v22, %v9789_v48  ;;  %v9889_v22 = vand.u32 4294901760, %v9875_v18 }
0x1005   : > { %8489 = vmatprep.mubr.f32.mxu1 %v6308_v45  ;;  %v6309_v27 = vsub.f32 %v6230_v23, %v6308_v45  ;;  %v6320_v28 = vand.u32 4294901760, %v6319_v25  ;;  %v9896_v23 = vand.u32 4294901760, %v9882_v20 }
0x1006   : > { %8490 = vmatmul.mubr.f32.vlgmr.msra.gmra.mxu1 %v9789_v48 }
0x1007   : > { %8512 = vmatpush3.msra.mxu1 %v9691_v34  ;;  %v6310_v31 = vand.u32 4294901760, %v6309_v27  ;;  %v6321_v52 = vsub.f32 %v6319_v25, %v6320_v28 }
0x1008   : > { %8513 = vmatprep.subr.mxu1 %v9696_v5 }
0x1009   : > { %8514 = vmatpush3.msra.mxu1 %v9696_v5  ;;  %8527 = vmatprep.mubr.f32.mxu1 %v6310_v31  ;;  %v6311_v49 = vsub.f32 %v6309_v27, %v6310_v31  ;;  %v6322_v3 = vand.u32 4294901760, %v6321_v52  ;;  %v7017_v52 = vsub.f32 %v9882_v20, %v9896_v23 }
0x100a   : > { %8515 = vmatprep.subr.mxu1 %v9706_v29 }
0x100b   : > { %8516 = vmatpush3.msra.mxu1 %v9706_v29  ;;  %v6312_v35 = vand.u32 4294901760, %v6311_v49 }
0x100c   : > { %8517 = vmatprep.subr.mxu1 %v9708_v41 }
0x100d   : > { %8518 = vmatpush3.msra.mxu1 %v9708_v41  ;;  %8470 = vmatprep.mubr.f32.mxu0 %v6312_v35  ;;  %v7018_v35 = vand.u32 4294901760, %v7017_v52 }
0x100e   : > { %8519 = vmatprep.subr.mxu1 %v9711_v46  ;;  %8471 = vmatmul.mubr.f32.vlgmr.msra.gmra.mxu0 %v6322_v3 }
0x100f   : > { %8493 = vmatpush3.msra.mxu0 %v9694_v36  ;;  %8520 = vmatpush3.msra.mxu1 %v9711_v46 }
0x1010   : > { %8494 = vmatprep.subr.mxu0 %v9704_v40  ;;  %8508 = vmatprep.mubr.f32.mxu0 %v6309_v27 }
0x1011   : > { %8521 = vmatprep.subr.mxu1 %v9713_v47  ;;  %8495 = vmatpush3.msra.mxu0 %v9704_v40 }
0x1012   : > { %8522 = vmatpush3.msra.mxu1 %v9713_v47  ;;  %8496 = vmatprep.subr.mxu0 %v9726_v55 }
0x1013   : > { %8523 = vmatprep.subr.mxu1 %v9716_v50  ;;  %8497 = vmatpush3.msra.mxu0 %v9726_v55 }
0x1014   : > { %8524 = vmatpush3.msra.mxu1 %v9716_v50  ;;  %8498 = vmatprep.subr.mxu0 %v9729_v56 }
0x1015   : > { %8525 = vmatprep.subr.mxu1 %v9718_v51  ;;  %8499 = vmatpush3.msra.mxu0 %v9729_v56 }
0x1016   : > { %8526 = vmatpush3.msra.mxu1 %v9718_v51  ;;  %8500 = vmatprep.subr.mxu0 %v9733_v57 }
0x1017   : > { %8528 = vmatmul.mubr.f32.vlgmr.msra.gmra.mxu1 %v6320_v28  ;;  %8549 = vmatprep.subr.mxu1 %v9691_v34 }
0x1018   : > { %8501 = vmatpush3.msra.mxu0 %v9733_v57  ;;  %8550 = vmatpush3.msra.mxu1 %v9691_v34 }
0x1019   : > { %8565 = vmatprep.mubr.f32.mxu1 %v6308_v45  ;;  %8502 = vmatprep.subr.mxu0 %v9736_v58 }
0x101a   : > { %8551 = vmatprep.subr.mxu1 %v9696_v5  ;;  %8503 = vmatpush3.msra.mxu0 %v9736_v58 }
0x101b   : > { %8552 = vmatpush3.msra.mxu1 %v9696_v5  ;;  %8504 = vmatprep.subr.mxu0 %v9739_v59 }
0x101c   : > { %8553 = vmatprep.subr.mxu1 %v9706_v29  ;;  %8505 = vmatpush3.msra.mxu0 %v9739_v59 }
0x101d   : > { %8554 = vmatpush3.msra.mxu1 %v9706_v29  ;;  %8506 = vmatprep.subr.mxu0 %v9743_v60 }
0x101e   : > { %8555 = vmatprep.subr.mxu1 %v9708_v41  ;;  %8507 = vmatpush3.msra.mxu0 %v9743_v60 }
0x101f   : > { %8556 = vmatpush3.msra.mxu1 %v9708_v41  ;;  %8509 = vmatmul.mubr.f32.vlgmr.msra.gmra.mxu0 %v6319_v25  ;;  %v7003_v25 = vsub.f32 %v9875_v18, %v9889_v22 }
0x1020   : > { %8530 = vmatprep.subr.mxu0 %v9701_v39  ;;  %8557 = vmatprep.subr.mxu1 %v9711_v46 }
0x1021   : > { %8531 = vmatpush3.msra.mxu0 %v9701_v39  ;;  %8546 = vmatprep.mubr.f32.mxu0 %v6308_v45  ;;  %v6996_v45 = vsub.f32 %v9872_v32, %v9886_v21  ;;  %v7004_v31 = vand.u32 4294901760, %v7003_v25 }
0x1022   : > { %8558 = vmatpush3.msra.mxu1 %v9711_v46  ;;  %8532 = vmatprep.subr.mxu0 %v9723_v54 }
0x1023   : > { %8559 = vmatprep.subr.mxu1 %v9713_v47  ;;  %8533 = vmatpush3.msra.mxu0 %v9723_v54  ;;  %v6997_v28 = vand.u32 4294901760, %v6996_v45 }
0x1024   : > { %8560 = vmatpush3.msra.mxu1 %v9713_v47  ;;  %8534 = vmatprep.subr.mxu0 %v9748_v63 }
0x1025   : > { %8561 = vmatprep.subr.mxu1 %v9716_v50  ;;  %8535 = vmatpush3.msra.mxu0 %v9748_v63 }
0x1026   : > { %8562 = vmatpush3.msra.mxu1 %v9716_v50  ;;  %8536 = vmatprep.subr.mxu0 %v9751_v24 }
0x1027   : > { %8563 = vmatprep.subr.mxu1 %v9718_v51  ;;  %8537 = vmatpush3.msra.mxu0 %v9751_v24 }
0x1028   : > { %8564 = vmatpush3.msra.mxu1 %v9718_v51  ;;  %8538 = vmatprep.subr.mxu0 %v9755_v1 }
0x1029   : > { %8566 = vmatmul.mubr.f32.vlgmr.msra.gmra.mxu1 %v9789_v48  ;;  %8539 = vmatpush3.msra.mxu0 %v9755_v1 }
0x102a   : > { %8540 = vmatprep.subr.mxu0 %v9758_v8  ;;  %8579 = vmatprep.subr.mxu1 %v6997_v28 }
0x102b   : > { %8541 = vmatpush3.msra.mxu0 %v9758_v8  ;;  %v7517_v8 = vld [vmem:[#allocation4 + $0x9] ss:$0 sm:$0xff]  ;;  %8580 = vmatpush3.msra.mxu1 %v6997_v28 }
0x102c   : > { %8542 = vmatprep.subr.mxu0 %v9766_v2  ;;  %8581 = vmatprep.subr.mxu1 %v7004_v31 }
0x102d   : > { %8543 = vmatpush3.msra.mxu0 %v9766_v2  ;;  %8582 = vmatpush3.msra.mxu1 %v7004_v31 }
0x102e   : > { %8544 = vmatprep.subr.mxu0 %v9774_v12 }
0x102f   : > { %8545 = vmatpush3.msra.mxu0 %v9774_v12 }
0x1030   : > { %8547 = vmatmul.mubr.f32.vlgmr.msra.gmra.mxu0 %v9789_v48  ;;  %8568 = vmatprep.subr.mxu0 %v9863_v14  ;;  %v9892_v48 = vand.u32 4294901760, %v9878_v19 }
0x1031   : > { %8569 = vmatpush3.msra.mxu0 %v9863_v14 }
0x1032   : > { %8570 = vmatprep.subr.mxu0 %v9865_v15  ;;  %v7010_v27 = vsub.f32 %v9878_v19, %v9892_v48 }
0x1033   : > { %8571 = vmatpush3.msra.mxu0 %v9865_v15 }
0x1034   : > { %8572 = vmatprep.subr.mxu0 %v9867_v10  ;;  %v7011_v49 = vand.u32 4294901760, %v7010_v27 }
0x1035   : > { %8573 = vmatpush3.msra.mxu0 %v9867_v10 }
0x1036   : > { %8574 = vmatprep.subr.mxu0 %v9869_v17  ;;  %8583 = vmatprep.subr.mxu1 %v7011_v49 }
0x1037   : > { %8575 = vmatpush3.msra.mxu0 %v9869_v17  ;;  %8584 = vmatpush3.msra.mxu1 %v7011_v49 }
0x1038   : > { %8590 = vmatprep.subr.mxu0 %v9872_v32  ;;  %8585 = vmatprep.subr.mxu1 %v7018_v35 }
0x1039   : > { %8586 = vmatpush3.msra.mxu1 %v7018_v35 }
0x103a   : > { %8601 = vmatprep.subr.mxu1 %v9863_v14 }
0x10c6   : > { %v8491_v36 = vpop.f32.mrf.mxu1 }
0x10c8   : > { %v6435_v40 = vpop.f32.mrf.mxu1 }
0x10ce   : > { %v8472_v34 = vpop.f32.mrf.mxu0 }
0x10cf   : > { %v6442_v29 = vadd.f32 %v8491_v36, %v8472_v34 }
0x10d0   : > { %v6314_v5 = vpop.f32.mrf.mxu0 }
0x10d1   : > { %v6436_v47 = vadd.f32 %v6435_v40, %v6314_v5 }
0x10d7   : > { %v8529_v41 = vpop.f32.mrf.mxu1 }
0x10d9   : > { %v6617_v54 = vpop.f32.mrf.mxu1 }
0x10df   : > { %v8510_v39 = vpop.f32.mrf.mxu0 }
0x10e0   : > { %v6537_v50 = vadd.f32 %v8510_v39, %v6442_v29 }
0x10e1   : > { %v6529_v46 = vpop.f32.mrf.mxu0 }
0x10e2   : > { %v6530_v51 = vadd.f32 %v6529_v46, %v6436_v47  ;;  %v6626_v55 = vadd.f32 %v8529_v41, %v6537_v50  ;;  %v7518_v41 = vld [vmem:[#allocation4 + $0x4] ss:$0 sm:$0xff]  ;;  %v7519_v50 = vld [vmem:[#allocation4 + $0x5] ss:$0 sm:$0xff] }
0x10e4   : > { %v6618_v59 = vadd.f32 %v6617_v54, %v6530_v51 }
0x10e9   : > { %v8567_v56 = vpop.f32.mrf.mxu1 }
0x10eb   : > { %v6805_v1 = vpop.f32.mrf.mxu1 }
0x10f0   : > { %v8548_v57 = vpop.f32.mrf.mxu0 }
0x10f1   : > { %v6727_v58 = vadd.f32 %v8548_v57, %v6626_v55 }
0x10f2   : > { %v6720_v60 = vpop.f32.mrf.mxu0 }
0x10f3   : > { %v6812_v63 = vadd.f32 %v8567_v56, %v6727_v58  ;;  %v6721_v24 = vadd.f32 %v6720_v60, %v6618_v59 }
0x10f5   : > { %v6806_v2 = vadd.f32 %v6805_v1, %v6721_v24  ;;  %v6816_v12 = vadd.f32 %v6812_v63, %v9592_v30 }
0x10f7   : > { %v6823_v37 = vadd.f32 %v7517_v8, %v6816_v12  ;;  %v6815_v38 = vadd.f32 %v6806_v2, %v9596_v33 }
0x10f9   : > { %v6829_v42 = vsel %vm230_vm0, %v6823_v37, 0.0  ;;  %v6822_v43 = vadd.f32 %v7517_v8, %v6815_v38 }
0x10fa   : > { %6830 = vadd.xlane.f32.xlu1 %v6829_v42 }
0x10fb   : > { %v6826_v44 = vsel %vm230_vm0, %v6822_v43, 0.0 }
0x10fc   : > { %6827 = vadd.xlane.f32.xlu0 %v6826_v44  ;;  %v7520_v44 = vld [vmem:[#allocation4 + $0xa] ss:$0 sm:$0xff] }
0x1183   : > { %v6831_v53 = vpop.xlane.xlu1 %6830 }
0x1184   : > { %v6833_v61 = vmul.f32 0.03125, %v6831_v53 }
0x1185   : > { %v6828_v62 = vpop.xlane.xlu0 %6827 }
0x1186   : > { %v6835_v26 = vsub.f32 %v6823_v37, %v6833_v61  ;;  %v6832_v6 = vmul.f32 0.03125, %v6828_v62 }
0x1188   : > { %v6834_v0 = vsub.f32 %v6822_v43, %v6832_v6  ;;  %v6837_v4 = vmul.f32 %v6835_v26, %v6835_v26 }
0x118a   : > { %v6841_v7 = vsel %vm230_vm0, %v6837_v4, 0.0  ;;  %v6836_v30 = vmul.f32 %v6834_v0, %v6834_v0 }
0x118b   : > { %6842 = vadd.xlane.f32.xlu1 %v6841_v7 }
0x118c   : > { %v6838_v33 = vsel %vm230_vm0, %v6836_v30, 0.0 }
0x118d   : > { %6839 = vadd.xlane.f32.xlu0 %v6838_v33 }
0x1214   : > { %v6843_v3 = vpop.xlane.xlu1 %6842 }
0x1215   : > { %v6845_v34 = vmul.f32 0.03125, %v6843_v3 }
0x1216   : > { %v6840_v36 = vpop.xlane.xlu0 %6839 }
0x1217   : > { %v6847_v5 = vadd.f32 1e-05, %v6845_v34  ;;  %v6844_v39 = vmul.f32 0.03125, %v6840_v36 }
0x1219   : > { %8755 = vrsqrt.f32 %v6847_v5  ;;  %v6846_v40 = vadd.f32 1e-05, %v6844_v39 }
0x121b   : > { %8757 = vrsqrt.f32 %v6846_v40 }
0x1226   : > { %v8756_v29 = vpop.eup %8755 }
0x1227   : > { %v6851_v46 = vmul.f32 %v8756_v29, %v6835_v26 }
0x1228   : > { %v8758_v47 = vpop.eup %8757 }
0x1229   : > { %v6850_v51 = vmul.f32 %v8758_v47, %v6834_v0  ;;  %v6857_v54 = vmul.f32 %v7518_v41, %v6851_v46 }
0x122b   : > { %v6856_v55 = vmul.f32 %v7518_v41, %v6850_v51  ;;  %v6863_v56 = vadd.f32 %v7519_v50, %v6857_v54 }
0x122d   : > { %v6862_v57 = vadd.f32 %v7519_v50, %v6856_v55  ;;  %v6877_v58 = vsel %vm230_vm0, %v6863_v56, 0 }
0x122e   : > { %v6958_v59 = vand.u32 4294901760, %v6877_v58 }
0x122f   : > { %v6874_v60 = vsel %vm230_vm0, %v6862_v57, 0 }
0x1230   : > { %v6948_v63 = vand.u32 4294901760, %v6874_v60  ;;  %v6959_v24 = vsub.f32 %v6877_v58, %v6958_v59 }
0x1232   : > { %8587 = vmatprep.mubr.f32.mxu1 %v6948_v63  ;;  %v6949_v1 = vsub.f32 %v6874_v60, %v6948_v63  ;;  %v6960_v8 = vand.u32 4294901760, %v6959_v24 }
0x1233   : > { %8588 = vmatmul.mubr.f32.vlgmr.msra.gmra.mxu1 %v6958_v59 }
0x1234   : > { %8602 = vmatpush3.msra.mxu1 %v9863_v14  ;;  %v6950_v2 = vand.u32 4294901760, %v6949_v1  ;;  %v6961_v37 = vsub.f32 %v6959_v24, %v6960_v8 }
0x1235   : > { %8603 = vmatprep.subr.mxu1 %v9865_v15 }
0x1236   : > { %8604 = vmatpush3.msra.mxu1 %v9865_v15  ;;  %8609 = vmatprep.mubr.f32.mxu1 %v6950_v2  ;;  %v6951_v12 = vsub.f32 %v6949_v1, %v6950_v2  ;;  %v6962_v42 = vand.u32 4294901760, %v6961_v37 }
0x1237   : > { %8605 = vmatprep.subr.mxu1 %v9867_v10 }
0x1238   : > { %8606 = vmatpush3.msra.mxu1 %v9867_v10  ;;  %v6952_v38 = vand.u32 4294901760, %v6951_v12 }
0x1239   : > { %8607 = vmatprep.subr.mxu1 %v9869_v17 }
0x123a   : > { %8608 = vmatpush3.msra.mxu1 %v9869_v17  ;;  %8576 = vmatprep.mubr.f32.mxu0 %v6952_v38 }
0x123b   : > { %8610 = vmatmul.mubr.f32.vlgmr.msra.gmra.mxu1 %v6960_v8  ;;  %8623 = vmatprep.subr.mxu1 %v9863_v14 }
0x123c   : > { %8577 = vmatmul.mubr.f32.vlgmr.msra.gmra.mxu0 %v6962_v42  ;;  %8624 = vmatpush3.msra.mxu1 %v9863_v14 }
0x123d   : > { %8591 = vmatpush3.msra.mxu0 %v9872_v32  ;;  %8631 = vmatprep.mubr.f32.mxu1 %v6948_v63 }
0x123e   : > { %8592 = vmatprep.subr.mxu0 %v9875_v18  ;;  %8598 = vmatprep.mubr.f32.mxu0 %v6949_v1 }
0x123f   : > { %8625 = vmatprep.subr.mxu1 %v9865_v15  ;;  %8593 = vmatpush3.msra.mxu0 %v9875_v18 }
0x1240   : > { %8626 = vmatpush3.msra.mxu1 %v9865_v15  ;;  %8594 = vmatprep.subr.mxu0 %v9878_v19 }
0x1241   : > { %8627 = vmatprep.subr.mxu1 %v9867_v10  ;;  %8595 = vmatpush3.msra.mxu0 %v9878_v19 }
0x1242   : > { %8628 = vmatpush3.msra.mxu1 %v9867_v10  ;;  %8596 = vmatprep.subr.mxu0 %v9882_v20 }
0x1243   : > { %8629 = vmatprep.subr.mxu1 %v9869_v17  ;;  %8597 = vmatpush3.msra.mxu0 %v9882_v20 }
0x1244   : > { %8630 = vmatpush3.msra.mxu1 %v9869_v17  ;;  %8599 = vmatmul.mubr.f32.vlgmr.msra.gmra.mxu0 %v6959_v24 }
0x1245   : > { %8612 = vmatprep.subr.mxu0 %v9886_v21  ;;  %8632 = vmatmul.mubr.f32.vlgmr.msra.gmra.mxu1 %v6958_v59 }
0x1246   : > { %8613 = vmatpush3.msra.mxu0 %v9886_v21  ;;  %8620 = vmatprep.mubr.f32.mxu0 %v6948_v63 }
0x1247   : > { %8614 = vmatprep.subr.mxu0 %v9889_v22 }
0x1248   : > { %8615 = vmatpush3.msra.mxu0 %v9889_v22 }
0x1249   : > { %8616 = vmatprep.subr.mxu0 %v9892_v48 }
0x124a   : > { %8617 = vmatpush3.msra.mxu0 %v9892_v48 }
0x124b   : > { %8618 = vmatprep.subr.mxu0 %v9896_v23 }
0x124c   : > { %8619 = vmatpush3.msra.mxu0 %v9896_v23 }
0x124d   : > { %8621 = vmatmul.mubr.f32.vlgmr.msra.gmra.mxu0 %v6958_v59 }
0x12f3   : > { %v8589_v53 = vpop.f32.mrf.mxu1 }
0x12f5   : > { %v7055_v0 = vpop.f32.mrf.mxu1 }
0x12fb   : > { %v8611_v4 = vpop.f32.mrf.mxu1 }
0x12fc   : > { %v8578_v43 = vpop.f32.mrf.mxu0 }
0x12fd   : > { %v6965_v62 = vadd.f32 %v8578_v43, %v7520_v44  ;;  %v7225_v13 = vpop.f32.mrf.mxu1 }
0x12fe   : > { %v6954_v61 = vpop.f32.mrf.mxu0 }
0x12ff   : > { %v6955_v26 = vadd.f32 %v7520_v44, %v6954_v61  ;;  %v7062_v7 = vadd.f32 %v8589_v53, %v6965_v62 }
0x1301   : > { %v7056_v33 = vadd.f32 %v7055_v0, %v6955_v26 }
0x1304   : > { %v8600_v6 = vpop.f32.mrf.mxu0 }
0x1305   : > { %v7149_v11 = vadd.f32 %v8600_v6, %v7062_v7  ;;  %v8633_v14 = vpop.f32.mrf.mxu1 }
0x1306   : > { %v7141_v30 = vpop.f32.mrf.mxu0 }
0x1307   : > { %v7142_v9 = vadd.f32 %v7141_v30, %v7056_v33  ;;  %v7234_v15 = vadd.f32 %v8611_v4, %v7149_v11  ;;  %v7397_v19 = vpop.f32.mrf.mxu1 }
0x1309   : > { %v7226_v16 = vadd.f32 %v7225_v13, %v7142_v9 }
0x130d   : > { %v8622_v10 = vpop.f32.mrf.mxu0 }
0x130e   : > { %v7323_v17 = vadd.f32 %v8622_v10, %v7234_v15 }
0x130f   : > { %v7316_v32 = vpop.f32.mrf.mxu0 }
0x1310   : > { %v7317_v18 = vadd.f32 %v7316_v32, %v7226_v16  ;;  %v7404_v21 = vadd.f32 %v8633_v14, %v7323_v17 }
0x1312   : > { %v7398_v20 = vadd.f32 %v7397_v19, %v7317_v18  ;;  %7408 = vst [vmem:[%s220_s21 + $0x8] sm:$0xff] %v7404_v21 }
0x1314   : > { %7407 = vst [vmem:[%s220_s21] sm:$0xff] %v7398_v20 }
0x1315 PF: > { %p14_p7 = scmp.ge.s32.totalorder %s8994_s6, 4   ;;  %s9979_s12 = smov %s8873_s13 }
0x1316   : > { %s9980_s13 = smov %s8877_s14  ;;  %s9981_s14 = smov %s9005_s10 }
0x1317   : > { %s9982_s15 = smov %s8994_s6  ;;  %16 = sbr.rel (!%p14_p7) target bundleno = 4 (0x4), region = 80 }
0x131c   :  { %7431 = vsyncpa [#allocation3], 1 }
0x131d   :  { %7433 = vsyncpa [#allocation3 + $0x1], 1 }
0x131e   :  { %7434 = vsyncpa [#allocation5], 1 }

</bundles_post_ra>
